<compile_context>
chip_gen: v7x
topology: tpu7x:2x2x1
jax: 0.10.0
libtpu: 0.0.40
codegen_flags: <defaults>
</compile_context>

<pallas_src>
import functools
import itertools
from collections import namedtuple

import jax
import jax.numpy as jnp
from jax.experimental import pallas as pl
from jax.experimental.pallas import tpu as pltpu


# ---------------------------------------------------------------------------
# Helpers
# ---------------------------------------------------------------------------
def _round_up(v, m):
    return ((v + m - 1) // m) * m


def _pick_tm(m, k, tn, has_res, budget=8 << 20):
    """Largest row tile (multiple of 16, <=1024) whose double-buffered bf16
    tiles fit a conservative VMEM budget (safe under v5e's 16 MiB default)."""
    fixed = 2 * 2 * k * tn                                  # W tile, dbl-buffered
    per_row = 2 * 2 * (k + tn + (tn if has_res else 0))     # A + out (+res) rows
    cap = (budget - fixed) // per_row
    cap = max(16, min(1024, (cap // 16) * 16))
    return min(_round_up(m, 16), cap)


# ---------------------------------------------------------------------------
# Pallas kernels
# ---------------------------------------------------------------------------
def _gemm_kernel(a_ref, w_ref, b_ref, o_ref, *, relu):
    """(tm, K) @ (K, tn) with fused bias (+ReLU). BN scale pre-folded into W."""
    y = jnp.dot(a_ref[...], w_ref[...], preferred_element_type=jnp.float32)
    y = y + b_ref[...]
    if relu:
        y = jnp.maximum(y, 0.0)
    o_ref[...] = y.astype(o_ref.dtype)


def _gemm_res_kernel(a_ref, w_ref, b_ref, r_ref, o_ref, *, relu):
    """Same as _gemm_kernel but fuses the residual add before the ReLU."""
    y = jnp.dot(a_ref[...], w_ref[...], preferred_element_type=jnp.float32)
    y = y + b_ref[...] + r_ref[...].astype(jnp.float32)
    if relu:
        y = jnp.maximum(y, 0.0)
    o_ref[...] = y.astype(o_ref.dtype)


def _tap_conv_kernel(x_ref, w_ref, b_ref, o_ref, *, shifts, cin, span, relu):
    """3x3 stride-1 conv as 9 in-kernel tap matmuls over a flattened padded
    image.  x_ref: (1, rows, Cin) flat padded image; w_ref: (9*Cin, tn);
    o_ref: (1, span, tn) where span = H * Wp (wrap columns discarded outside)."""
    tn = o_ref.shape[-1]
    acc = jnp.zeros((span, tn), jnp.float32)
    for t, s in enumerate(shifts):
        a = x_ref[0, s:s + span, :]
        wt = w_ref[t * cin:(t + 1) * cin, :]
        acc = acc + jnp.dot(a, wt, preferred_element_type=jnp.float32)
    y = acc + b_ref[...]
    if relu:
        y = jnp.maximum(y, 0.0)
    o_ref[0, :, :] = y.astype(o_ref.dtype)


def _max3_kernel(a_ref, b_ref, c_ref, o_ref):
    o_ref[...] = jnp.maximum(jnp.maximum(a_ref[...], b_ref[...]), c_ref[...])


# ---------------------------------------------------------------------------
# pallas_call factories (cached per unique shape so each compiles once)
# ---------------------------------------------------------------------------
@functools.lru_cache(maxsize=None)
def _get_gemm_call(m_pad, k, cout, tm, tn, relu, has_res, w_resident):
    kernel = functools.partial(_gemm_res_kernel if has_res else _gemm_kernel,
                               relu=relu)
    ni, nj = m_pad // tm, cout // tn
    if w_resident:           # inner axis = rows -> weight slab stays in VMEM
        grid = (nj, ni)
        a_map = lambda j, i: (i, 0)
        w_map = lambda j, i: (0, j)
        o_map = lambda j, i: (i, j)
    else:                    # inner axis = cout -> activation tile stays in VMEM
        grid = (ni, nj)
        a_map = lambda i, j: (i, 0)
        w_map = lambda i, j: (0, j)
        o_map = lambda i, j: (i, j)

    in_specs = [pl.BlockSpec((tm, k), a_map),
                pl.BlockSpec((k, tn), w_map),
                pl.BlockSpec((1, tn), w_map)]
    if has_res:
        in_specs.append(pl.BlockSpec((tm, tn), o_map))

    bytes_accessed = (m_pad * k + k * cout + m_pad * cout
                      + (m_pad * cout if has_res else 0)) * 2 + 4 * cout
    return pl.pallas_call(
        kernel,
        out_shape=jax.ShapeDtypeStruct((m_pad, cout), jnp.bfloat16),
        grid=grid,
        in_specs=in_specs,
        out_specs=pl.BlockSpec((tm, tn), o_map),
        compiler_params=pltpu.CompilerParams(
            dimension_semantics=("parallel", "parallel")),
        cost_estimate=pl.CostEstimate(flops=2 * m_pad * k * cout,
                                      transcendentals=0,
                                      bytes_accessed=bytes_accessed),
    )


@functools.lru_cache(maxsize=None)
def _get_tap_conv_call(n, rows, cin, cout, span, tn, shifts, relu, w_resident):
    kernel = functools.partial(_tap_conv_kernel, shifts=shifts, cin=cin,
                               span=span, relu=relu)
    kdim = len(shifts) * cin
    nj = cout // tn
    if w_resident:
        grid = (nj, n)
        x_map = lambda j, b: (b, 0, 0)
        w_map = lambda j, b: (0, j)
        o_map = lambda j, b: (b, 0, j)
    else:
        grid = (n, nj)
        x_map = lambda b, j: (b, 0, 0)
        w_map = lambda b, j: (0, j)
        o_map = lambda b, j: (b, 0, j)

    bytes_accessed = (n * rows * cin + kdim * cout + n * span * cout) * 2 + 4 * cout
    return pl.pallas_call(
        kernel,
        out_shape=jax.ShapeDtypeStruct((n, span, cout), jnp.bfloat16),
        grid=grid,
        in_specs=[pl.BlockSpec((1, rows, cin), x_map),
                  pl.BlockSpec((kdim, tn), w_map),
                  pl.BlockSpec((1, tn), w_map)],
        out_specs=pl.BlockSpec((1, span, tn), o_map),
        compiler_params=pltpu.CompilerParams(
            dimension_semantics=("parallel", "parallel")),
        cost_estimate=pl.CostEstimate(flops=2 * n * span * kdim * cout,
                                      transcendentals=0,
                                      bytes_accessed=bytes_accessed),
    )


@functools.lru_cache(maxsize=None)
def _get_max3_call(rows_pad, tm, dtype):
    spec = pl.BlockSpec((tm, 128), lambda i: (i, 0))
    return pl.pallas_call(
        _max3_kernel,
        out_shape=jax.ShapeDtypeStruct((rows_pad, 128), jnp.dtype(dtype)),
        grid=(rows_pad // tm,),
        in_specs=[spec, spec, spec],
        out_specs=spec,
        compiler_params=pltpu.CompilerParams(dimension_semantics=("parallel",)),
    )


# ---------------------------------------------------------------------------
# Conv wrappers
# ---------------------------------------------------------------------------
def _im2col_cols(x, kh, kw, stride, dilation, padding, pad_k_to=None):
    """x: (N,H,W,C) -> (N*Ho*Wo, kh*kw*C [+pad]) with taps folded into K."""
    n, h, w, c = x.shape
    if kh == 1 and kw == 1 and padding == 0:
        if stride == 1:
            return x.reshape(n * h * w, c), (n, h, w)
        xs = x[:, ::stride, ::stride, :]
        _, ho, wo, _ = xs.shape
        return xs.reshape(n * ho * wo, c), (n, ho, wo)
    if padding > 0:
        x = jnp.pad(x, ((0, 0), (padding, padding), (padding, padding), (0, 0)))
    hp, wp = h + 2 * padding, w + 2 * padding
    ho = (hp - (dilation * (kh - 1) + 1)) // stride + 1
    wo = (wp - (dilation * (kw - 1) + 1)) // stride + 1
    cols = []
    for i in range(kh):
        for j in range(kw):
            r0, c0 = i * dilation, j * dilation
            sl = x[:, r0:r0 + stride * (ho - 1) + 1:stride,
                   c0:c0 + stride * (wo - 1) + 1:stride, :]
            cols.append(sl.reshape(n * ho * wo, c))
    k = kh * kw * c
    if pad_k_to is not None and pad_k_to > k:
        cols.append(jnp.zeros((n * ho * wo, pad_k_to - k), x.dtype))
    return jnp.concatenate(cols, axis=-1), (n, ho, wo)


def conv_gemm(x, w, bias, *, stride=1, dilation=1, padding=0, relu=False,
              residual=None, pad_k_to=None):
    """1x1 / im2col conv as a single GEMM with fused bias (+residual) (+ReLU)."""
    kh, kw, cin, cout = w.shape
    a, (n, ho, wo) = _im2col_cols(x, kh, kw, stride, dilation, padding, pad_k_to)
    a = a.astype(jnp.bfloat16)
    m, k = a.shape

    has_res = residual is not None
    tn = min(256, cout)
    tm = _pick_tm(m, k, tn, has_res)
    m_pad = _round_up(m, tm)
    if (m_pad // tm) * (cout // tn) < 2:          # keep both v7x TCs busy
        if cout > 128:
            tn = 128
        elif m_pad >= 32 and (m_pad // 2) % 8 == 0:
            tm = m_pad // 2
    if m_pad != m:
        a = jnp.pad(a, ((0, m_pad - m), (0, 0)))

    w2 = w.reshape(kh * kw * cin, cout)
    if k > kh * kw * cin:                          # lane-align K (stem 147->256)
        w2 = jnp.pad(w2, ((0, k - kh * kw * cin), (0, 0)))
    w2 = w2.astype(jnp.bfloat16)
    b2 = bias.reshape(1, cout).astype(jnp.float32)

    w_resident = k * cout > m_pad * k             # keep larger operand resident
    call = _get_gemm_call(m_pad, k, cout, tm, tn, bool(relu), has_res,
                          bool(w_resident))
    if has_res:
        r2 = residual.astype(jnp.bfloat16).reshape(m, cout)
        if m_pad != m:
            r2 = jnp.pad(r2, ((0, m_pad - m), (0, 0)))
        out = call(a, w2, b2, r2)
    else:
        out = call(a, w2, b2)
    return out[:m].reshape(n, ho, wo, cout)


def conv3x3_s1_tap(x, w, bias, *, dilation, relu):
    """3x3 stride-1 conv (padding == dilation) with in-kernel tap accumulation.

    The zero-padded image is flattened row-major per batch element; tap
    (ti, tj) is then a contiguous row window at offset ti*d*Wp + tj*d.  Output
    rows include Wp-W wrap columns per row which are sliced off afterwards."""
    n, h, wsp, cin = x.shape
    kh, kw, _, cout = w.shape
    d = dilation
    hp, wp = h + 2 * d, wsp + 2 * d
    span = h * wp
    shifts = tuple(ti * d * wp + tj * d for ti in range(kh) for tj in range(kw))
    rows = span + shifts[-1]                       # = hp*wp + 2*d

    xp = jnp.pad(x.astype(jnp.bfloat16), ((0, 0), (d, d), (d, d), (0, 0)))
    xf = xp.reshape(n, hp * wp, cin)
    xf = jnp.pad(xf, ((0, 0), (0, rows - hp * wp), (0, 0)))
    wf = w.reshape(kh * kw * cin, cout).astype(jnp.bfloat16)
    b2 = bias.reshape(1, cout).astype(jnp.float32)

    tn = min(256, cout)
    w_resident = kh * kw * cin * cout > n * rows * cin
    call = _get_tap_conv_call(n, rows, cin, cout, span, tn, shifts,
                              bool(relu), bool(w_resident))
    out = call(xf, wf, b2)                         # (n, span, cout)
    return out.reshape(n, h, wp, cout)[:, :, :wsp, :]


def maxpool_3x3_s2(x):
    """MaxPool2d(kernel_size=3, stride=2, padding=1) on NHWC bf16 input."""
    n, h, w, c = x.shape
    ho = (h - 1) // 2 + 1
    wo = (w - 1) // 2 + 1
    neg = float("-inf")

    # W-direction window max via pair-reshape (no tap stack, no strided gather).
    wp_target = 2 * (wo + 1)
    xp = jnp.pad(x, ((0, 0), (0, 0), (1, wp_target - w - 1), (0, 0)),
                 constant_values=neg)
    xr = xp.reshape(n, h, wo + 1, 2, c)
    pair_max = jnp.max(xr, axis=3)                                   # (n,h,wo+1,c)
    yw = jnp.maximum(pair_max[:, :, :wo, :], xr[:, :, 1:wo + 1, 0, :])  # (n,h,wo,c)

    # H-direction: 3 strided taps reduced in a lane-dense Pallas kernel.
    yp = jnp.pad(yw, ((0, 0), (1, 1), (0, 0), (0, 0)), constant_values=neg)
    taps = [yp[:, i:i + 2 * (ho - 1) + 1:2] for i in range(3)]        # (n,ho,wo,c)
    tot = n * ho * wo * c
    rows = pl.cdiv(tot, 128)
    tm = min(512, _round_up(rows, 8))
    rows_pad = _round_up(rows, tm)
    flat = [jnp.pad(t.reshape(-1), (0, rows_pad * 128 - tot)).reshape(rows_pad, 128)
            for t in taps]
    out = _get_max3_call(rows_pad, tm, str(x.dtype))(*flat)
    return out.reshape(-1)[:tot].reshape(n, ho, wo, c)


# ---------------------------------------------------------------------------
# ResNet-101 (DeepLabV3 variant) configuration + deterministic init
# ---------------------------------------------------------------------------
BlockCfg = namedtuple(
    "BlockCfg", ["inplanes", "planes", "stride", "dilation", "downsample"])


def resnet101_cfg(output_stride=16, multi_grid=(1, 2, 4)):
    blocks_per_layer = (3, 4, 23, 3)
    planes_per_layer = (64, 128, 256, 512)
    if output_stride == 16:
        replace, base_dilation = (False, False, True), 2
    elif output_stride == 8:
        replace, base_dilation = (False, True, True), 4
    else:
        replace, base_dilation = (False, False, False), 1

    inplanes, dilation = 64, 1
    layers = []
    for li in range(4):
        planes, nblocks = planes_per_layer[li], blocks_per_layer[li]
        stride = 1 if li == 0 else 2
        dilate = False if li == 0 else replace[li - 1]
        previous_dilation = dilation
        if dilate:
            dilation *= stride
            stride = 1
        blocks = []
        for b in range(nblocks):
            if b == 0:
                has_ds = (stride != 1) or (inplanes != planes * 4)
                blocks.append(BlockCfg(inplanes, planes, stride,
                                       previous_dilation, has_ds))
                inplanes = planes * 4
            else:
                blocks.append(BlockCfg(inplanes, planes, 1, dilation, False))
        layers.append(blocks)

    # DeepLabV3Backbone._apply_multi_grid: override layer4 conv2 dilation/padding.
    layers[3] = [blk._replace(dilation=base_dilation * multi_grid[i % len(multi_grid)])
                 for i, blk in enumerate(layers[3])]
    return tuple(tuple(l) for l in layers)


def init_backbone_params(key, cfg):
    counter = itertools.count(1)

    def nk():
        return jax.random.fold_in(key, next(counter))

    def conv_bn_fold(kh, kw, cin, cout, eps=1e-5):
        std = (2.0 / (kh * kw * cin)) ** 0.5
        w = std * jax.random.normal(nk(), (kh, kw, cin, cout), jnp.float32)
        gamma = 1.0 + 0.1 * jax.random.normal(nk(), (cout,), jnp.float32)
        beta = 0.1 * jax.random.normal(nk(), (cout,), jnp.float32)
        running_mean = jnp.zeros((cout,), jnp.float32)
        running_var = jnp.ones((cout,), jnp.float32)
        scale = gamma / jnp.sqrt(running_var + eps)
        bias = beta - running_mean * scale
        # Fold BN scale into the weight in f32, then quantize to bf16.
        w_folded = (w * scale[None, None, None, :]).astype(jnp.bfloat16)
        return w_folded, bias

    params = {}
    params["conv1_w"], params["conv1_b"] = conv_bn_fold(7, 7, 3, 64)
    layer_params = []
    for layer_cfg in cfg:
        blocks = []
        for blk in layer_cfg:
            width = blk.planes
            p = {}
            p["w1"], p["b1"] = conv_bn_fold(1, 1, blk.inplanes, width)
            p["w2"], p["b2"] = conv_bn_fold(3, 3, width, width)
            p["w3"], p["b3"] = conv_bn_fold(1, 1, width, blk.planes * 4)
            if blk.downsample:
                p["wd"], p["bd"] = conv_bn_fold(1, 1, blk.inplanes, blk.planes * 4)
            blocks.append(p)
        layer_params.append(blocks)
    params["layers"] = layer_params
    return params


# ---------------------------------------------------------------------------
# Jitted building blocks (shape-cached: identical blocks compile once)
# ---------------------------------------------------------------------------
@jax.jit
def _stem_forward(x_nchw, conv1_w, conv1_b):
    x = jnp.transpose(x_nchw, (0, 2, 3, 1)).astype(jnp.bfloat16)     # NCHW -> NHWC
    x = conv_gemm(x, conv1_w, conv1_b, stride=2, padding=3, relu=True,
                  pad_k_to=256)
    return maxpool_3x3_s2(x)


@functools.partial(jax.jit, static_argnums=(2, 3, 4))
def _bottleneck_forward(x, p, stride, dilation, has_ds):
    identity = x
    h = conv_gemm(x, p["w1"], p["b1"], relu=True)
    if stride == 1:
        h = conv3x3_s1_tap(h, p["w2"], p["b2"], dilation=dilation, relu=True)
    else:
        h = conv_gemm(h, p["w2"], p["b2"], stride=stride, dilation=dilation,
                      padding=dilation, relu=True)
    if has_ds:
        identity = conv_gemm(x, p["wd"], p["bd"], stride=stride, relu=False)
    return conv_gemm(h, p["w3"], p["b3"], relu=True, residual=identity)


# ---------------------------------------------------------------------------
# Forward pass (mirrors DeepLabV3Backbone.forward, use_cascaded=False)
# ---------------------------------------------------------------------------
def backbone_forward(x_nchw, params, cfg):
    x = _stem_forward(x_nchw, params["conv1_w"], params["conv1_b"])
    for layer_cfg, layer_p in zip(cfg, params["layers"]):
        for bcfg, bp in zip(layer_cfg, layer_p):
            x = _bottleneck_forward(x, bp, bcfg.stride, bcfg.dilation,
                                    bcfg.downsample)
    return jnp.transpose(x.astype(jnp.float32), (0, 3, 1, 2))        # NHWC -> NCHW


if __name__ == "__main__":
    key = jax.random.PRNGKey(0)
    cfg = resnet101_cfg(output_stride=16, multi_grid=(1, 2, 4))
    params = init_backbone_params(jax.random.fold_in(key, 1), cfg)

    # Small input consistent with the module: NCHW, 3 input channels.
    x = jax.random.normal(jax.random.fold_in(key, 2), (2, 3, 64, 64), jnp.float32)

    out = backbone_forward(x, params, cfg)
    out = jax.block_until_ready(out)

    assert out.shape == (2, 2048, 4, 4), out.shape                   # stride 16
    assert bool(jnp.all(jnp.isfinite(out)))
    print("KERNEL_OK")
</pallas_src>

<mosaic_0001>
module attributes {stable_mosaic.version = 11 : i64} {
  func.func @_gemm_kernel(%arg0: i32, %arg1: i32, %arg2: memref<1024x256xbf16, #tpu.memory_space<vmem>>, %arg3: memref<256x64xbf16, #tpu.memory_space<vmem>>, %arg4: memref<1x64xf32, #tpu.memory_space<vmem>>, %arg5: memref<1024x64xbf16, #tpu.memory_space<vmem>>) attributes {dimension_semantics = [#tpu.dimension_semantics<parallel>, #tpu.dimension_semantics<parallel>], iteration_bounds = array<i64: 2, 1>, scalar_prefetch = 0 : i64, scratch_operands = 0 : i64, tpu.core_type = #tpu.core_type<tc>, window_params = [{transform_indices = @transform_0, window_bounds = array<i64: 1024, 256>}, {transform_indices = @transform_1, window_bounds = array<i64: 256, 64>}, {transform_indices = @transform_2, window_bounds = array<i64: 1, 64>}, {transform_indices = @transform_3, window_bounds = array<i64: 1024, 64>}]} {
    %c0 = arith.constant 0 : index
    %c0_0 = arith.constant 0 : index
    %0 = vector.load %arg2[%c0, %c0_0] : memref<1024x256xbf16, #tpu.memory_space<vmem>>, vector<1024x256xbf16>
    %c0_1 = arith.constant 0 : index
    %c0_2 = arith.constant 0 : index
    %1 = vector.load %arg3[%c0_1, %c0_2] : memref<256x64xbf16, #tpu.memory_space<vmem>>, vector<256x64xbf16>
    %cst = arith.constant dense<0.000000e+00> : vector<1024x64xf32>
    %2 = tpu.matmul %0, %1, %cst {dimension_numbers = #tpu.dot_dimension_numbers<[1], [0], [0], [1], [0, 0, 1, 1], [], []>} : vector<1024x256xbf16>, vector<256x64xbf16>, vector<1024x64xf32> -> vector<1024x64xf32>
    %c0_3 = arith.constant 0 : index
    %c0_4 = arith.constant 0 : index
    %3 = vector.load %arg4[%c0_3, %c0_4] : memref<1x64xf32, #tpu.memory_space<vmem>>, vector<1x64xf32>
    %4 = vector.broadcast %3 : vector<1x64xf32> to vector<1024x64xf32>
    %5 = arith.addf %2, %4 : vector<1024x64xf32>
    %cst_5 = arith.constant 0.000000e+00 : f32
    %6 = vector.broadcast %cst_5 : f32 to vector<1024x64xf32>
    %7 = arith.maximumf %5, %6 : vector<1024x64xf32>
    %8 = arith.truncf %7 : vector<1024x64xf32> to vector<1024x64xbf16>
    %c0_6 = arith.constant 0 : index
    %c0_7 = arith.constant 0 : index
    %9 = vector.load %arg5[%c0_6, %c0_7] : memref<1024x64xbf16, #tpu.memory_space<vmem>>, vector<1024x64xbf16>
    tpu.vector_store %arg5[%c0_6, %c0_7], %8 {strides = array<i32>} : memref<1024x64xbf16, #tpu.memory_space<vmem>>, vector<1024x64xbf16>,
    return
  }
  func.func @transform_0(%arg0: i32, %arg1: i32) -> (i32, i32) {
    %c0_i32 = arith.constant 0 : i32
    %c0_i32_0 = arith.constant 0 : i32
    return %arg0, %c0_i32 : i32, i32
  }
  func.func @transform_1(%arg0: i32, %arg1: i32) -> (i32, i32) {
    %c0_i32 = arith.constant 0 : i32
    %c0_i32_0 = arith.constant 0 : i32
    return %c0_i32, %arg1 : i32, i32
  }
  func.func @transform_2(%arg0: i32, %arg1: i32) -> (i32, i32) {
    %c0_i32 = arith.constant 0 : i32
    %c0_i32_0 = arith.constant 0 : i32
    return %c0_i32, %arg1 : i32, i32
  }
  func.func @transform_3(%arg0: i32, %arg1: i32) -> (i32, i32) {
    %c0_i32 = arith.constant 0 : i32
    return %arg0, %arg1 : i32, i32
  }
}

module attributes {stable_mosaic.version = 11 : i64} {
  func.func @_max3_kernel(%arg0: i32, %arg1: memref<256x128xbf16, #tpu.memory_space<vmem>>, %arg2: memref<256x128xbf16, #tpu.memory_space<vmem>>, %arg3: memref<256x128xbf16, #tpu.memory_space<vmem>>, %arg4: memref<256x128xbf16, #tpu.memory_space<vmem>>) attributes {dimension_semantics = [#tpu.dimension_semantics<parallel>], iteration_bounds = array<i64: 1>, scalar_prefetch = 0 : i64, scratch_operands = 0 : i64, tpu.core_type = #tpu.core_type<tc>, window_params = [{transform_indices = @transform_0, window_bounds = array<i64: 256, 128>}, {transform_indices = @transform_1, window_bounds = array<i64: 256, 128>}, {transform_indices = @transform_2, window_bounds = array<i64: 256, 128>}, {transform_indices = @transform_3, window_bounds = array<i64: 256, 128>}]} {
    %c0 = arith.constant 0 : index
    %c0_0 = arith.constant 0 : index
    %0 = vector.load %arg1[%c0, %c0_0] : memref<256x128xbf16, #tpu.memory_space<vmem>>, vector<256x128xbf16>
    %c0_1 = arith.constant 0 : index
    %c0_2 = arith.constant 0 : index
    %1 = vector.load %arg2[%c0_1, %c0_2] : memref<256x128xbf16, #tpu.memory_space<vmem>>, vector<256x128xbf16>
    %2 = arith.maximumf %0, %1 : vector<256x128xbf16>
    %c0_3 = arith.constant 0 : index
    %c0_4 = arith.constant 0 : index
    %3 = vector.load %arg3[%c0_3, %c0_4] : memref<256x128xbf16, #tpu.memory_space<vmem>>, vector<256x128xbf16>
    %4 = arith.maximumf %2, %3 : vector<256x128xbf16>
    %c0_5 = arith.constant 0 : index
    %c0_6 = arith.constant 0 : index
    %5 = vector.load %arg4[%c0_5, %c0_6] : memref<256x128xbf16, #tpu.memory_space<vmem>>, vector<256x128xbf16>
    tpu.vector_store %arg4[%c0_5, %c0_6], %4 {strides = array<i32>} : memref<256x128xbf16, #tpu.memory_space<vmem>>, vector<256x128xbf16>,
    return
  }
  func.func @transform_0(%arg0: i32) -> (i32, i32) {
    %c0_i32 = arith.constant 0 : i32
    %c0_i32_0 = arith.constant 0 : i32
    return %arg0, %c0_i32 : i32, i32
  }
  func.func @transform_1(%arg0: i32) -> (i32, i32) {
    %c0_i32 = arith.constant 0 : i32
    %c0_i32_0 = arith.constant 0 : i32
    return %arg0, %c0_i32 : i32, i32
  }
  func.func @transform_2(%arg0: i32) -> (i32, i32) {
    %c0_i32 = arith.constant 0 : i32
    %c0_i32_0 = arith.constant 0 : i32
    return %arg0, %c0_i32 : i32, i32
  }
  func.func @transform_3(%arg0: i32) -> (i32, i32) {
    %c0_i32 = arith.constant 0 : i32
    %c0_i32_0 = arith.constant 0 : i32
    return %arg0, %c0_i32 : i32, i32
  }
}

</mosaic_0001>

<bundles_post_ra>
// kernel: _stem_forward.2
= control target key start
LH: loop header
LB: loop body
LE: loop exit
PB: predicated region body
PF: predicated region fallthrough
CT: control target
= control target key end

     0   :  { %s3275_s12 = smov 0   ;;  %s3277_s13 = smov 0   ;;  %s3918_s0 = inlined_call_operand.vmem [shape: bf16[2048,256], index: 0, kind: input, shape index: {}]   ;;  %s3919_s1 = inlined_call_operand.vmem [shape: bf16[256,64], index: 1, kind: input, shape index: {}]   ;;  %s3920_s2 = inlined_call_operand.vmem [shape: f32[1,64], index: 2, kind: input, shape index: {}]   ;;  %s3921_s3 = inlined_call_operand.vmem [shape: bf16[2048,64], index: 3, kind: output, shape index: {}]  }
   0x1   :  { %s3279_s14 = smov 0  }
   0x2 LB: > { %s25_s15 = sadd.s32 1, %s3248_s13  ;;  %p2554_p0 = scmp.ge.s32.totalorder %s3252_s14, 1  ;;  %s3252_s14 = sphi %s3279_s14, %s13_s14   ;;  %s3248_s13 = sphi %s3277_s13, %s3923_s13   ;;  %s3244_s12 = sphi %s3275_s12, %s3922_s12  }
   0x3   : > { %p27_p1 = scmp.ge.s32.totalorder %s25_s15, 2  ;;  %p170_p2 = scmp.lt.s32.totalorder %s3252_s14, 3 }
   0x5   : > { %s3925_s15 = smov (%p27_p1, %s25_s15), 0  ;;  %p171_p3 = pnand %p2554_p0, %p170_p2 }
   0x6   : > { %v3021_v0 = vld [vmem:[%s3919_s1] sm:$0xff] (!%p171_p3)   ;;  %v3254_v1 = vmov (!%p171_p3), 0   ;;  %s2555_s18 = sshll.u32 (!%p171_p3), %s3244_s12, 7  ;;  %v3022_v2 = vld [vmem:[%s3919_s1 + $0x8] sm:$0xff] (!%p171_p3)   ;;  %v3023_v3 = vld [vmem:[%s3919_s1 + $0x10] sm:$0xff] (!%p171_p3)   ;;  %vm2317_vm0 = vcmask (!%p171_p3), 519168  }
   0x7   : > { %174 = sbr.rel (%p171_p3) target bundleno = 540 (0x21c), region = 32  ;;  %1132 = vmatprep.subr.bf16.mxu0 (!%p171_p3), %v3254_v1  ;;  %2964 = vmatprep.subr.bf16.mxu1 (!%p171_p3), %v3254_v1  ;;  %p206_p4 = scmp.lt.s32.totalorder (!%p171_p3), %s2555_s18, 255  ;;  %v3024_v4 = vld [vmem:[%s3919_s1 + $0x18] sm:$0xff] (!%p171_p3)   ;;  %v3025_v5 = vld [vmem:[%s3919_s1 + $0x20] sm:$0xff] (!%p171_p3)   ;;  %v3026_v7 = vld [vmem:[%s3919_s1 + $0x28] sm:$0xff] (!%p171_p3)  }
   0x8   : > { %1133 = vmatpush1.bf16.msra.mxu0 (!%p171_p3), %v3021_v0  ;;  %2980 = vmatpush1.bf16.msra.mxu1 (!%p171_p3), %v3021_v0  ;;  %v3027_v9 = vld [vmem:[%s3919_s1 + $0x30] sm:$0xff] (!%p171_p3)   ;;  %v3028_v10 = vld [vmem:[%s3919_s1 + $0x38] sm:$0xff] (!%p171_p3)   ;;  %v3029_v11 = vld [vmem:[%s3919_s1 + $0x40] sm:$0xff] (!%p171_p3)  }
   0x9   : > { %1134 = vmatprep.subr.bf16.mxu0 (!%p171_p3), %v3254_v1  ;;  %2965 = vmatprep.subr.bf16.mxu1 (!%p171_p3), %v3254_v1  ;;  %v3030_v12 = vld [vmem:[%s3919_s1 + $0x48] sm:$0xff] (!%p171_p3)   ;;  %v3031_v13 = vld [vmem:[%s3919_s1 + $0x50] sm:$0xff] (!%p171_p3)   ;;  %v3032_v14 = vld [vmem:[%s3919_s1 + $0x58] sm:$0xff] (!%p171_p3)  }
   0xa   : > { %v3033_v15 = vld [vmem:[%s3919_s1 + $0x60] sm:$0xff] (!%p171_p3)   ;;  %v3034_v16 = vld [vmem:[%s3919_s1 + $0x68] sm:$0xff] (!%p171_p3)   ;;  %v3035_v17 = vld [vmem:[%s3919_s1 + $0x70] sm:$0xff] (!%p171_p3)  }
   0xb   : > { %v3036_v18 = vld [vmem:[%s3919_s1 + $0x78] sm:$0xff] (!%p171_p3)  }
   0xc   : > { %1135 = vmatpush1.bf16.msra.mxu0 (!%p171_p3), %v3022_v2  ;;  %2981 = vmatpush1.bf16.msra.mxu1 (!%p171_p3), %v3022_v2 }
   0xd   : > { %1136 = vmatprep.subr.bf16.mxu0 (!%p171_p3), %v3254_v1  ;;  %2966 = vmatprep.subr.bf16.mxu1 (!%p171_p3), %v3254_v1 }
   0xe   : > { %s3927_s18 = smov (!%p206_p4, %s2555_s18), 255 }
   0xf   : > { %s2835_s25 = sshll.u32 %s3927_s18, 3  ;;  %s2559_s6 = sshll.u32 %s3927_s18, 2 }
  0x10   : > { %1137 = vmatpush1.bf16.msra.mxu0 %v3023_v3  ;;  %2982 = vmatpush1.bf16.msra.mxu1 %v3023_v3  ;;  %s3322_s30 = scalar_lea.vmem %s3918_s0, %s2835_s25  ;;  %s3508_s8 = scalar_lea.vmem %s3921_s3, %s2559_s6 }
  0x11   : > { %1138 = vmatprep.subr.bf16.mxu0 %v3254_v1  ;;  %2967 = vmatprep.subr.bf16.mxu1 %v3254_v1  ;;  %v3039_v6 = vld [vmem:[%s3322_s30 + $0x4] ss:$8 sps:$4 sm:$0xff]   ;;  %v3037_v19 = vld [vmem:[%s3322_s30] ss:$8 sps:$4 sm:$0xff]   ;;  %v3043_v21 = vld [vmem:[%s3322_s30 + $0x14] ss:$8 sps:$4 sm:$0xff]  }
  0x12   : > { %v3042_v8 = vld [vmem:[%s3322_s30 + $0x204] ss:$8 sps:$4 sm:$0xff]   ;;  %1164 = vmatprep.mubr.bf16.mxu0 %v3039_v6  ;;  %v3040_v20 = vld [vmem:[%s3322_s30 + $0x200] ss:$8 sps:$4 sm:$0xff]   ;;  %v3045_v22 = vld [vmem:[%s3322_s30 + $0x214] ss:$8 sps:$4 sm:$0xff]  }
  0x13   : > { %1420 = vmatprep.mubr.bf16.mxu1 %v3042_v8  ;;  %v3047_v23 = vld [vmem:[%s3322_s30 + $0x10] ss:$8 sps:$4 sm:$0xff]   ;;  %v3049_v25 = vld [vmem:[%s3322_s30 + $0x24] ss:$8 sps:$4 sm:$0xff]   ;;  %v3053_v27 = vld [vmem:[%s3322_s30 + $0x20] ss:$8 sps:$4 sm:$0xff]  }
  0x14   : > { %1139 = vmatpush1.bf16.msra.mxu0 %v3024_v4  ;;  %2983 = vmatpush1.bf16.msra.mxu1 %v3024_v4  ;;  %v3048_v24 = vld [vmem:[%s3322_s30 + $0x210] ss:$8 sps:$4 sm:$0xff]   ;;  %v3051_v26 = vld [vmem:[%s3322_s30 + $0x224] ss:$8 sps:$4 sm:$0xff]   ;;  %v3054_v28 = vld [vmem:[%s3322_s30 + $0x220] ss:$8 sps:$4 sm:$0xff]  }
  0x15   : > { %1140 = vmatprep.subr.bf16.mxu0 %v3254_v1  ;;  %2968 = vmatprep.subr.bf16.mxu1 %v3254_v1  ;;  %v3055_v29 = vld [vmem:[%s3322_s30 + $0x34] ss:$8 sps:$4 sm:$0xff]   ;;  %v3059_v31 = vld [vmem:[%s3322_s30 + $0x30] ss:$8 sps:$4 sm:$0xff]   ;;  %v3061_v33 = vld [vmem:[%s3322_s30 + $0x44] ss:$8 sps:$4 sm:$0xff]  }
  0x16   : > { %v3057_v30 = vld [vmem:[%s3322_s30 + $0x234] ss:$8 sps:$4 sm:$0xff]   ;;  %v3060_v32 = vld [vmem:[%s3322_s30 + $0x230] ss:$8 sps:$4 sm:$0xff]   ;;  %v3063_v34 = vld [vmem:[%s3322_s30 + $0x244] ss:$8 sps:$4 sm:$0xff]  }
  0x17   : > { %v3065_v35 = vld [vmem:[%s3322_s30 + $0x40] ss:$8 sps:$4 sm:$0xff]   ;;  %v3067_v37 = vld [vmem:[%s3322_s30 + $0x54] ss:$8 sps:$4 sm:$0xff]   ;;  %v3071_v39 = vld [vmem:[%s3322_s30 + $0x50] ss:$8 sps:$4 sm:$0xff]  }
  0x18   : > { %1141 = vmatpush1.bf16.msra.mxu0 %v3025_v5  ;;  %2984 = vmatpush1.bf16.msra.mxu1 %v3025_v5  ;;  %v3066_v36 = vld [vmem:[%s3322_s30 + $0x240] ss:$8 sps:$4 sm:$0xff]   ;;  %v3069_v38 = vld [vmem:[%s3322_s30 + $0x254] ss:$8 sps:$4 sm:$0xff]   ;;  %v3072_v40 = vld [vmem:[%s3322_s30 + $0x250] ss:$8 sps:$4 sm:$0xff]  }
  0x19   : > { %1142 = vmatprep.subr.bf16.mxu0 %v3254_v1  ;;  %2969 = vmatprep.subr.bf16.mxu1 %v3254_v1  ;;  %v3073_v41 = vld [vmem:[%s3322_s30 + $0x64] ss:$8 sps:$4 sm:$0xff]   ;;  %v3077_v43 = vld [vmem:[%s3322_s30 + $0x60] ss:$8 sps:$4 sm:$0xff]   ;;  %v3079_v45 = vld [vmem:[%s3322_s30 + $0x74] ss:$8 sps:$4 sm:$0xff]  }
  0x1a   : > { %v3075_v42 = vld [vmem:[%s3322_s30 + $0x264] ss:$8 sps:$4 sm:$0xff]   ;;  %v3078_v44 = vld [vmem:[%s3322_s30 + $0x260] ss:$8 sps:$4 sm:$0xff]   ;;  %v3081_v46 = vld [vmem:[%s3322_s30 + $0x274] ss:$8 sps:$4 sm:$0xff]  }
  0x1b   : > { %v3083_v47 = vld [vmem:[%s3322_s30 + $0x70] ss:$8 sps:$4 sm:$0xff]   ;;  %v3085_v49 = vld [vmem:[%s3322_s30 + $0x84] ss:$8 sps:$4 sm:$0xff]   ;;  %v3089_v51 = vld [vmem:[%s3322_s30 + $0x80] ss:$8 sps:$4 sm:$0xff]  }
  0x1c   : > { %1143 = vmatpush1.bf16.msra.mxu0 %v3026_v7  ;;  %2985 = vmatpush1.bf16.msra.mxu1 %v3026_v7  ;;  %v3084_v48 = vld [vmem:[%s3322_s30 + $0x270] ss:$8 sps:$4 sm:$0xff]   ;;  %v3087_v50 = vld [vmem:[%s3322_s30 + $0x284] ss:$8 sps:$4 sm:$0xff]   ;;  %v3090_v52 = vld [vmem:[%s3322_s30 + $0x280] ss:$8 sps:$4 sm:$0xff]  }
  0x1d   : > { %1144 = vmatprep.subr.bf16.mxu0 %v3254_v1  ;;  %2970 = vmatprep.subr.bf16.mxu1 %v3254_v1  ;;  %v3091_v53 = vld [vmem:[%s3322_s30 + $0x94] ss:$8 sps:$4 sm:$0xff]   ;;  %v3095_v55 = vld [vmem:[%s3322_s30 + $0x90] ss:$8 sps:$4 sm:$0xff]   ;;  %v3097_v57 = vld [vmem:[%s3322_s30 + $0xa4] ss:$8 sps:$4 sm:$0xff]  }
  0x1e   : > { %v3093_v54 = vld [vmem:[%s3322_s30 + $0x294] ss:$8 sps:$4 sm:$0xff]   ;;  %v3096_v56 = vld [vmem:[%s3322_s30 + $0x290] ss:$8 sps:$4 sm:$0xff]   ;;  %v3099_v58 = vld [vmem:[%s3322_s30 + $0x2a4] ss:$8 sps:$4 sm:$0xff]  }
  0x1f   : > { %v3101_v59 = vld [vmem:[%s3322_s30 + $0xa0] ss:$8 sps:$4 sm:$0xff]   ;;  %v3103_v61 = vld [vmem:[%s3322_s30 + $0xb4] ss:$8 sps:$4 sm:$0xff]   ;;  %v3107_v63 = vld [vmem:[%s3322_s30 + $0xb0] ss:$8 sps:$4 sm:$0xff]  }
  0x20   : > { %1145 = vmatpush1.bf16.msra.mxu0 %v3027_v9  ;;  %2986 = vmatpush1.bf16.msra.mxu1 %v3027_v9  ;;  %v3102_v60 = vld [vmem:[%s3322_s30 + $0x2a0] ss:$8 sps:$4 sm:$0xff]   ;;  %v3105_v62 = vld [vmem:[%s3322_s30 + $0x2b4] ss:$8 sps:$4 sm:$0xff]   ;;  %v3108_v0 = vld [vmem:[%s3322_s30 + $0x2b0] ss:$8 sps:$4 sm:$0xff]  }
  0x21   : > { %1146 = vmatprep.subr.bf16.mxu0 %v3254_v1  ;;  %2971 = vmatprep.subr.bf16.mxu1 %v3254_v1  ;;  %v3111_v2 = vld [vmem:[%s3322_s30 + $0x2c4] ss:$8 sps:$4 sm:$0xff]   ;;  %v3113_v3 = vld [vmem:[%s3322_s30 + $0xc0] ss:$8 sps:$4 sm:$0xff]   ;;  %v3115_v5 = vld [vmem:[%s3322_s30 + $0xd4] ss:$8 sps:$4 sm:$0xff]  }
  0x22   : > { %v3114_v4 = vld [vmem:[%s3322_s30 + $0x2c0] ss:$8 sps:$4 sm:$0xff]   ;;  %v3117_v6 = vld [vmem:[%s3322_s30 + $0x2d4] ss:$8 sps:$4 sm:$0xff]   ;;  %v3119_v7 = vld [vmem:[%s3322_s30 + $0xd0] ss:$8 sps:$4 sm:$0xff]  }
  0x23   : > { %v3120_v8 = vld [vmem:[%s3322_s30 + $0x2d0] ss:$8 sps:$4 sm:$0xff]   ;;  %v3121_v9 = vld [vmem:[%s3322_s30 + $0xe4] ss:$8 sps:$4 sm:$0xff]  }
  0x24   : > { %1147 = vmatpush1.bf16.msra.mxu0 %v3028_v10  ;;  %2987 = vmatpush1.bf16.msra.mxu1 %v3028_v10  ;;  %v3123_v10 = vld [vmem:[%s3322_s30 + $0x2e4] ss:$8 sps:$4 sm:$0xff]  }
  0x25   : > { %1148 = vmatprep.subr.bf16.mxu0 %v3254_v1  ;;  %2972 = vmatprep.subr.bf16.mxu1 %v3254_v1 }
  0x28   : > { %1149 = vmatpush1.bf16.msra.mxu0 %v3029_v11  ;;  %2988 = vmatpush1.bf16.msra.mxu1 %v3029_v11  ;;  %v3125_v11 = vld [vmem:[%s3322_s30 + $0xe0] ss:$8 sps:$4 sm:$0xff]  }
  0x29   : > { %1150 = vmatprep.subr.bf16.mxu0 %v3254_v1  ;;  %2973 = vmatprep.subr.bf16.mxu1 %v3254_v1 }
  0x2c   : > { %1151 = vmatpush1.bf16.msra.mxu0 %v3030_v12  ;;  %2989 = vmatpush1.bf16.msra.mxu1 %v3030_v12  ;;  %v3126_v12 = vld [vmem:[%s3322_s30 + $0x2e0] ss:$8 sps:$4 sm:$0xff]  }
  0x2d   : > { %1152 = vmatprep.subr.bf16.mxu0 %v3254_v1  ;;  %2974 = vmatprep.subr.bf16.mxu1 %v3254_v1 }
  0x30   : > { %1153 = vmatpush1.bf16.msra.mxu0 %v3031_v13  ;;  %2990 = vmatpush1.bf16.msra.mxu1 %v3031_v13  ;;  %v3127_v13 = vld [vmem:[%s3322_s30 + $0xf4] ss:$8 sps:$4 sm:$0xff]  }
  0x31   : > { %1154 = vmatprep.subr.bf16.mxu0 %v3254_v1  ;;  %2975 = vmatprep.subr.bf16.mxu1 %v3254_v1 }
  0x34   : > { %1155 = vmatpush1.bf16.msra.mxu0 %v3032_v14  ;;  %2991 = vmatpush1.bf16.msra.mxu1 %v3032_v14  ;;  %v3129_v14 = vld [vmem:[%s3322_s30 + $0x2f4] ss:$8 sps:$4 sm:$0xff]  }
  0x35   : > { %1156 = vmatprep.subr.bf16.mxu0 %v3254_v1  ;;  %2976 = vmatprep.subr.bf16.mxu1 %v3254_v1 }
  0x38   : > { %1157 = vmatpush1.bf16.msra.mxu0 %v3033_v15  ;;  %2992 = vmatpush1.bf16.msra.mxu1 %v3033_v15  ;;  %v3131_v15 = vld [vmem:[%s3322_s30 + $0xf0] ss:$8 sps:$4 sm:$0xff]  }
  0x39   : > { %1158 = vmatprep.subr.bf16.mxu0 %v3254_v1  ;;  %2977 = vmatprep.subr.bf16.mxu1 %v3254_v1 }
  0x3c   : > { %1159 = vmatpush1.bf16.msra.mxu0 %v3034_v16  ;;  %2993 = vmatpush1.bf16.msra.mxu1 %v3034_v16  ;;  %v3132_v16 = vld [vmem:[%s3322_s30 + $0x2f0] ss:$8 sps:$4 sm:$0xff]  }
  0x3d   : > { %1160 = vmatprep.subr.bf16.mxu0 %v3254_v1  ;;  %2978 = vmatprep.subr.bf16.mxu1 %v3254_v1 }
  0x40   : > { %1161 = vmatpush1.bf16.msra.mxu0 %v3035_v17  ;;  %2994 = vmatpush1.bf16.msra.mxu1 %v3035_v17  ;;  %v3133_v17 = vld [vmem:[%s3322_s30 + $0x104] ss:$8 sps:$4 sm:$0xff]  }
  0x41   : > { %1162 = vmatprep.subr.bf16.mxu0 %v3254_v1  ;;  %2979 = vmatprep.subr.bf16.mxu1 %v3254_v1  ;;  %v3109_v1 = vld [vmem:[%s3322_s30 + $0xc4] ss:$8 sps:$4 sm:$0xff]  }
  0x44   : > { %1163 = vmatpush1.bf16.msra.mxu0 %v3036_v18  ;;  %2995 = vmatpush1.bf16.msra.mxu1 %v3036_v18  ;;  %v3135_v18 = vld [vmem:[%s3322_s30 + $0x304] ss:$8 sps:$4 sm:$0xff]  }
  0x47   : > { %1165 = vmatmul.mubr.bf16.vlgmr.msra.gmra.mrb[0].mxu0 %v3037_v19  ;;  %1421 = vmatmul.mubr.bf16.vlgmr.msra.gmra.mrb[0].mxu1 %v3040_v20  ;;  %v3137_v19 = vld [vmem:[%s3322_s30 + $0x100] ss:$8 sps:$4 sm:$0xff]  }
  0x48   : > { %1172 = vmatprep.mubr.bf16.mxu0 %v3043_v21  ;;  %1428 = vmatprep.mubr.bf16.mxu1 %v3045_v22  ;;  %v3138_v20 = vld [vmem:[%s3322_s30 + $0x300] ss:$8 sps:$4 sm:$0xff]   ;;  %v3139_v21 = vld [vmem:[%s3322_s30 + $0x114] ss:$8 sps:$4 sm:$0xff]  }
  0x49   : > { %v3141_v22 = vld [vmem:[%s3322_s30 + $0x314] ss:$8 sps:$4 sm:$0xff]  }
  0x4f   : > { %1173 = vmatmul.mubr.bf16.gmra.mrb[4].mxu0 %v3047_v23  ;;  %1429 = vmatmul.mubr.bf16.gmra.mrb[4].mxu1 %v3048_v24  ;;  %v3143_v23 = vld [vmem:[%s3322_s30 + $0x110] ss:$8 sps:$4 sm:$0xff]  }
  0x50   : > { %1180 = vmatprep.mubr.bf16.mxu0 %v3049_v25  ;;  %1436 = vmatprep.mubr.bf16.mxu1 %v3051_v26  ;;  %v3144_v24 = vld [vmem:[%s3322_s30 + $0x310] ss:$8 sps:$4 sm:$0xff]   ;;  %v3145_v25 = vld [vmem:[%s3322_s30 + $0x124] ss:$8 sps:$4 sm:$0xff]  }
  0x51   : > { %v3147_v26 = vld [vmem:[%s3322_s30 + $0x324] ss:$8 sps:$4 sm:$0xff]  }
  0x57   : > { %1181 = vmatmul.mubr.bf16.gmra.mrb[8].mxu0 %v3053_v27  ;;  %1437 = vmatmul.mubr.bf16.gmra.mrb[8].mxu1 %v3054_v28  ;;  %v3149_v27 = vld [vmem:[%s3322_s30 + $0x120] ss:$8 sps:$4 sm:$0xff]  }
  0x58   : > { %1188 = vmatprep.mubr.bf16.mxu0 %v3055_v29  ;;  %1444 = vmatprep.mubr.bf16.mxu1 %v3057_v30  ;;  %v3150_v28 = vld [vmem:[%s3322_s30 + $0x320] ss:$8 sps:$4 sm:$0xff]   ;;  %v3151_v29 = vld [vmem:[%s3322_s30 + $0x134] ss:$8 sps:$4 sm:$0xff]  }
  0x59   : > { %v3153_v30 = vld [vmem:[%s3322_s30 + $0x334] ss:$8 sps:$4 sm:$0xff]  }
  0x5f   : > { %1189 = vmatmul.mubr.bf16.gmra.mrb[12].mxu0 %v3059_v31  ;;  %1445 = vmatmul.mubr.bf16.gmra.mrb[12].mxu1 %v3060_v32  ;;  %v3155_v31 = vld [vmem:[%s3322_s30 + $0x130] ss:$8 sps:$4 sm:$0xff]  }
  0x60   : > { %1196 = vmatprep.mubr.bf16.mxu0 %v3061_v33  ;;  %1452 = vmatprep.mubr.bf16.mxu1 %v3063_v34  ;;  %v3156_v32 = vld [vmem:[%s3322_s30 + $0x330] ss:$8 sps:$4 sm:$0xff]   ;;  %v3157_v33 = vld [vmem:[%s3322_s30 + $0x144] ss:$8 sps:$4 sm:$0xff]  }
  0x61   : > { %v3159_v34 = vld [vmem:[%s3322_s30 + $0x344] ss:$8 sps:$4 sm:$0xff]  }
  0x67   : > { %1197 = vmatmul.mubr.bf16.gmra.mrb[16].mxu0 %v3065_v35  ;;  %1453 = vmatmul.mubr.bf16.gmra.mrb[16].mxu1 %v3066_v36  ;;  %v3161_v35 = vld [vmem:[%s3322_s30 + $0x140] ss:$8 sps:$4 sm:$0xff]  }
  0x68   : > { %1204 = vmatprep.mubr.bf16.mxu0 %v3067_v37  ;;  %1460 = vmatprep.mubr.bf16.mxu1 %v3069_v38  ;;  %v3162_v36 = vld [vmem:[%s3322_s30 + $0x340] ss:$8 sps:$4 sm:$0xff]   ;;  %v3163_v37 = vld [vmem:[%s3322_s30 + $0x154] ss:$8 sps:$4 sm:$0xff]  }
  0x69   : > { %v3165_v38 = vld [vmem:[%s3322_s30 + $0x354] ss:$8 sps:$4 sm:$0xff]  }
  0x6f   : > { %1205 = vmatmul.mubr.bf16.gmra.mrb[20].mxu0 %v3071_v39  ;;  %1461 = vmatmul.mubr.bf16.gmra.mrb[20].mxu1 %v3072_v40  ;;  %v3167_v39 = vld [vmem:[%s3322_s30 + $0x150] ss:$8 sps:$4 sm:$0xff]  }
  0x70   : > { %1212 = vmatprep.mubr.bf16.mxu0 %v3073_v41  ;;  %1468 = vmatprep.mubr.bf16.mxu1 %v3075_v42  ;;  %v3168_v40 = vld [vmem:[%s3322_s30 + $0x350] ss:$8 sps:$4 sm:$0xff]   ;;  %v3169_v41 = vld [vmem:[%s3322_s30 + $0x164] ss:$8 sps:$4 sm:$0xff]  }
  0x71   : > { %v3171_v42 = vld [vmem:[%s3322_s30 + $0x364] ss:$8 sps:$4 sm:$0xff]  }
  0x77   : > { %1213 = vmatmul.mubr.bf16.gmra.mrb[24].mxu0 %v3077_v43  ;;  %1469 = vmatmul.mubr.bf16.gmra.mrb[24].mxu1 %v3078_v44  ;;  %v3173_v43 = vld [vmem:[%s3322_s30 + $0x160] ss:$8 sps:$4 sm:$0xff]  }
  0x78   : > { %1220 = vmatprep.mubr.bf16.mxu0 %v3079_v45  ;;  %1476 = vmatprep.mubr.bf16.mxu1 %v3081_v46  ;;  %v3174_v44 = vld [vmem:[%s3322_s30 + $0x360] ss:$8 sps:$4 sm:$0xff]   ;;  %v3175_v45 = vld [vmem:[%s3322_s30 + $0x174] ss:$8 sps:$4 sm:$0xff]  }
  0x79   : > { %v3177_v46 = vld [vmem:[%s3322_s30 + $0x374] ss:$8 sps:$4 sm:$0xff]  }
  0x7f   : > { %1221 = vmatmul.mubr.bf16.gmra.mrb[28].mxu0 %v3083_v47  ;;  %1477 = vmatmul.mubr.bf16.gmra.mrb[28].mxu1 %v3084_v48  ;;  %v3179_v47 = vld [vmem:[%s3322_s30 + $0x170] ss:$8 sps:$4 sm:$0xff]  }
  0x80   : > { %1228 = vmatprep.mubr.bf16.mxu0 %v3085_v49  ;;  %1484 = vmatprep.mubr.bf16.mxu1 %v3087_v50  ;;  %v3180_v48 = vld [vmem:[%s3322_s30 + $0x370] ss:$8 sps:$4 sm:$0xff]   ;;  %v3181_v49 = vld [vmem:[%s3322_s30 + $0x184] ss:$8 sps:$4 sm:$0xff]  }
  0x81   : > { %v3183_v50 = vld [vmem:[%s3322_s30 + $0x384] ss:$8 sps:$4 sm:$0xff]  }
  0x87   : > { %1229 = vmatmul.mubr.bf16.gmra.mrb[32].mxu0 %v3089_v51  ;;  %1485 = vmatmul.mubr.bf16.gmra.mrb[32].mxu1 %v3090_v52  ;;  %v3185_v51 = vld [vmem:[%s3322_s30 + $0x180] ss:$8 sps:$4 sm:$0xff]  }
  0x88   : > { %1236 = vmatprep.mubr.bf16.mxu0 %v3091_v53  ;;  %1492 = vmatprep.mubr.bf16.mxu1 %v3093_v54  ;;  %v3186_v52 = vld [vmem:[%s3322_s30 + $0x380] ss:$8 sps:$4 sm:$0xff]   ;;  %v3187_v53 = vld [vmem:[%s3322_s30 + $0x194] ss:$8 sps:$4 sm:$0xff]  }
  0x89   : > { %v3189_v54 = vld [vmem:[%s3322_s30 + $0x394] ss:$8 sps:$4 sm:$0xff]  }
  0x8f   : > { %1237 = vmatmul.mubr.bf16.gmra.mrb[36].mxu0 %v3095_v55  ;;  %1493 = vmatmul.mubr.bf16.gmra.mrb[36].mxu1 %v3096_v56  ;;  %v3191_v55 = vld [vmem:[%s3322_s30 + $0x190] ss:$8 sps:$4 sm:$0xff]  }
  0x90   : > { %1244 = vmatprep.mubr.bf16.mxu0 %v3097_v57  ;;  %1500 = vmatprep.mubr.bf16.mxu1 %v3099_v58  ;;  %v3192_v56 = vld [vmem:[%s3322_s30 + $0x390] ss:$8 sps:$4 sm:$0xff]   ;;  %v3193_v57 = vld [vmem:[%s3322_s30 + $0x1a4] ss:$8 sps:$4 sm:$0xff]  }
  0x91   : > { %v3195_v58 = vld [vmem:[%s3322_s30 + $0x3a4] ss:$8 sps:$4 sm:$0xff]  }
  0x97   : > { %1245 = vmatmul.mubr.bf16.gmra.mrb[40].mxu0 %v3101_v59  ;;  %1501 = vmatmul.mubr.bf16.gmra.mrb[40].mxu1 %v3102_v60  ;;  %v3197_v59 = vld [vmem:[%s3322_s30 + $0x1a0] ss:$8 sps:$4 sm:$0xff]  }
  0x98   : > { %1252 = vmatprep.mubr.bf16.mxu0 %v3103_v61  ;;  %1508 = vmatprep.mubr.bf16.mxu1 %v3105_v62  ;;  %v3198_v60 = vld [vmem:[%s3322_s30 + $0x3a0] ss:$8 sps:$4 sm:$0xff]   ;;  %v3199_v61 = vld [vmem:[%s3322_s30 + $0x1b4] ss:$8 sps:$4 sm:$0xff]  }
  0x99   : > { %v3201_v62 = vld [vmem:[%s3322_s30 + $0x3b4] ss:$8 sps:$4 sm:$0xff]  }
  0x9f   : > { %1253 = vmatmul.mubr.bf16.gmra.mrb[44].mxu0 %v3107_v63  ;;  %1509 = vmatmul.mubr.bf16.gmra.mrb[44].mxu1 %v3108_v0  ;;  %v3494_v63 = vld [vmem:[%s3920_s2] ss:$0 sm:$0xff] }
  0xa0   : > { %1260 = vmatprep.mubr.bf16.mxu0 %v3109_v1  ;;  %1516 = vmatprep.mubr.bf16.mxu1 %v3111_v2 }
  0xa7   : > { %1261 = vmatmul.mubr.bf16.gmra.mrb[48].mxu0 %v3113_v3  ;;  %1517 = vmatmul.mubr.bf16.gmra.mrb[48].mxu1 %v3114_v4 }
  0xa8   : > { %1268 = vmatprep.mubr.bf16.mxu0 %v3115_v5  ;;  %1524 = vmatprep.mubr.bf16.mxu1 %v3117_v6  ;;  %v3203_v6 = vld [vmem:[%s3322_s30 + $0x1b0] ss:$8 sps:$4 sm:$0xff]  }
  0xaf   : > { %1269 = vmatmul.mubr.bf16.gmra.mrb[52].mxu0 %v3119_v7  ;;  %1525 = vmatmul.mubr.bf16.gmra.mrb[52].mxu1 %v3120_v8  ;;  %v3204_v7 = vld [vmem:[%s3322_s30 + $0x3b0] ss:$8 sps:$4 sm:$0xff]  }
  0xb0   : > { %1276 = vmatprep.mubr.bf16.mxu0 %v3121_v9  ;;  %1532 = vmatprep.mubr.bf16.mxu1 %v3123_v10  ;;  %v3205_v10 = vld [vmem:[%s3322_s30 + $0x1c4] ss:$8 sps:$4 sm:$0xff]  }
  0xb7   : > { %1277 = vmatmul.mubr.bf16.gmra.mrb[56].mxu0 %v3125_v11  ;;  %1533 = vmatmul.mubr.bf16.gmra.mrb[56].mxu1 %v3126_v12  ;;  %v3207_v11 = vld [vmem:[%s3322_s30 + $0x3c4] ss:$8 sps:$4 sm:$0xff]  }
  0xb8   : > { %1284 = vmatprep.mubr.bf16.mxu0 %v3127_v13  ;;  %1540 = vmatprep.mubr.bf16.mxu1 %v3129_v14 }
  0xbf   : > { %1285 = vmatmul.mubr.bf16.gmra.mrb[60].mxu0 %v3131_v15  ;;  %1541 = vmatmul.mubr.bf16.gmra.mrb[60].mxu1 %v3132_v16 }
  0xc0   : > { %1292 = vmatprep.mubr.bf16.mxu0 %v3133_v17  ;;  %1548 = vmatprep.mubr.bf16.mxu1 %v3135_v18 }
  0xc7   : > { %1293 = vmatmul.mubr.bf16.gmra.mrb[64].mxu0 %v3137_v19  ;;  %1549 = vmatmul.mubr.bf16.gmra.mrb[64].mxu1 %v3138_v20 }
  0xc8   : > { %1300 = vmatprep.mubr.bf16.mxu0 %v3139_v21  ;;  %1556 = vmatprep.mubr.bf16.mxu1 %v3141_v22 }
  0xcf   : > { %1301 = vmatmul.mubr.bf16.gmra.mrb[68].mxu0 %v3143_v23  ;;  %1557 = vmatmul.mubr.bf16.gmra.mrb[68].mxu1 %v3144_v24 }
  0xd0   : > { %1308 = vmatprep.mubr.bf16.mxu0 %v3145_v25  ;;  %1564 = vmatprep.mubr.bf16.mxu1 %v3147_v26 }
  0xd7   : > { %1309 = vmatmul.mubr.bf16.gmra.mrb[72].mxu0 %v3149_v27  ;;  %1565 = vmatmul.mubr.bf16.gmra.mrb[72].mxu1 %v3150_v28 }
  0xd8   : > { %1316 = vmatprep.mubr.bf16.mxu0 %v3151_v29  ;;  %1572 = vmatprep.mubr.bf16.mxu1 %v3153_v30  ;;  %v3209_v30 = vld [vmem:[%s3322_s30 + $0x1c0] ss:$8 sps:$4 sm:$0xff]  }
  0xdf   : > { %1317 = vmatmul.mubr.bf16.gmra.mrb[76].mxu0 %v3155_v31  ;;  %1573 = vmatmul.mubr.bf16.gmra.mrb[76].mxu1 %v3156_v32  ;;  %v3210_v31 = vld [vmem:[%s3322_s30 + $0x3c0] ss:$8 sps:$4 sm:$0xff]  }
  0xe0   : > { %1324 = vmatprep.mubr.bf16.mxu0 %v3157_v33  ;;  %1580 = vmatprep.mubr.bf16.mxu1 %v3159_v34  ;;  %v3211_v34 = vld [vmem:[%s3322_s30 + $0x1d4] ss:$8 sps:$4 sm:$0xff]  }
  0xe7   : > { %1325 = vmatmul.mubr.bf16.gmra.mrb[80].mxu0 %v3161_v35  ;;  %1581 = vmatmul.mubr.bf16.gmra.mrb[80].mxu1 %v3162_v36  ;;  %v3213_v35 = vld [vmem:[%s3322_s30 + $0x3d4] ss:$8 sps:$4 sm:$0xff]  }
  0xe8   : > { %1332 = vmatprep.mubr.bf16.mxu0 %v3163_v37  ;;  %1588 = vmatprep.mubr.bf16.mxu1 %v3165_v38 }
  0xef   : > { %1333 = vmatmul.mubr.bf16.gmra.mrb[84].mxu0 %v3167_v39  ;;  %1589 = vmatmul.mubr.bf16.gmra.mrb[84].mxu1 %v3168_v40 }
  0xf0   : > { %1340 = vmatprep.mubr.bf16.mxu0 %v3169_v41  ;;  %1596 = vmatprep.mubr.bf16.mxu1 %v3171_v42 }
  0xf7   : > { %1341 = vmatmul.mubr.bf16.gmra.mrb[88].mxu0 %v3173_v43  ;;  %1597 = vmatmul.mubr.bf16.gmra.mrb[88].mxu1 %v3174_v44 }
  0xf8   : > { %1348 = vmatprep.mubr.bf16.mxu0 %v3175_v45  ;;  %1604 = vmatprep.mubr.bf16.mxu1 %v3177_v46 }
  0xff   : > { %1349 = vmatmul.mubr.bf16.gmra.mrb[92].mxu0 %v3179_v47  ;;  %1605 = vmatmul.mubr.bf16.gmra.mrb[92].mxu1 %v3180_v48 }
 0x100   : > { %1356 = vmatprep.mubr.bf16.mxu0 %v3181_v49  ;;  %1612 = vmatprep.mubr.bf16.mxu1 %v3183_v50 }
 0x107   : > { %1357 = vmatmul.mubr.bf16.gmra.mrb[96].mxu0 %v3185_v51  ;;  %1613 = vmatmul.mubr.bf16.gmra.mrb[96].mxu1 %v3186_v52 }
 0x108   : > { %1364 = vmatprep.mubr.bf16.mxu0 %v3187_v53  ;;  %1620 = vmatprep.mubr.bf16.mxu1 %v3189_v54  ;;  %v3215_v54 = vld [vmem:[%s3322_s30 + $0x1d0] ss:$8 sps:$4 sm:$0xff]  }
 0x10f   : > { %1365 = vmatmul.mubr.bf16.gmra.mrb[100].mxu0 %v3191_v55  ;;  %1621 = vmatmul.mubr.bf16.gmra.mrb[100].mxu1 %v3192_v56  ;;  %v3216_v55 = vld [vmem:[%s3322_s30 + $0x3d0] ss:$8 sps:$4 sm:$0xff]  }
 0x110   : > { %1372 = vmatprep.mubr.bf16.mxu0 %v3193_v57  ;;  %1628 = vmatprep.mubr.bf16.mxu1 %v3195_v58  ;;  %v3217_v58 = vld [vmem:[%s3322_s30 + $0x1e4] ss:$8 sps:$4 sm:$0xff]  }
 0x117   : > { %1373 = vmatmul.mubr.bf16.gmra.mrb[104].mxu0 %v3197_v59  ;;  %1629 = vmatmul.mubr.bf16.gmra.mrb[104].mxu1 %v3198_v60  ;;  %v3219_v59 = vld [vmem:[%s3322_s30 + $0x3e4] ss:$8 sps:$4 sm:$0xff]  }
 0x118   : > { %1380 = vmatprep.mubr.bf16.mxu0 %v3199_v61  ;;  %1636 = vmatprep.mubr.bf16.mxu1 %v3201_v62 }
 0x11a   : > { %v1166_v0 = vpop.f32.mrb[0].mxu0  ;;  %v1422_v1 = vpop.f32.mrb[0].mxu1 }
 0x11b   : > { %v1167_v2 = vadd.f32 %v3494_v63, %v1166_v0  ;;  %v1423_v3 = vadd.f32 %v3494_v63, %v1422_v1  ;;  %v1168_v4 = vpop.f32.mrb[1].mxu0  ;;  %v1424_v5 = vpop.f32.mrb[1].mxu1 }
 0x11c   : > { %v1169_v8 = vpop.f32.mrb[2].mxu0  ;;  %v1425_v9 = vpop.f32.mrb[2].mxu1 }
 0x11d   : > { %v1677_v12 = vmax.f32 %v1167_v2, 0.0  ;;  %v1741_v13 = vmax.f32 %v1423_v3, 0.0  ;;  %v1170_v14 = vadd.f32 %v3494_v63, %v1169_v8  ;;  %v1426_v15 = vadd.f32 %v3494_v63, %v1425_v9  ;;  %v1171_v16 = vpop.f32.mrb[3].mxu0  ;;  %v1427_v17 = vpop.f32.mrb[3].mxu1 }
 0x11e   : > { %v3222_v16 = vld [vmem:[%s3322_s30 + $0x3e0] ss:$8 sps:$4 sm:$0xff]  }
 0x11f   : > { %v2836_v18 = vpack.c.bf16 %v1677_v12, %v1677_v12  ;;  %v2900_v19 = vpack.c.bf16 %v1741_v13, %v1741_v13  ;;  %v1678_v20 = vmax.f32 %v1170_v14, 0.0  ;;  %v1742_v21 = vmax.f32 %v1426_v15, 0.0  ;;  %1381 = vmatmul.mubr.bf16.gmra.mrb[108].mxu0 %v3203_v6  ;;  %1637 = vmatmul.mubr.bf16.gmra.mrb[108].mxu1 %v3204_v7  ;;  %v3221_v15 = vld [vmem:[%s3322_s30 + $0x1e0] ss:$8 sps:$4 sm:$0xff]  }
 0x120   : > { %1388 = vmatprep.mubr.bf16.mxu0 %v3205_v10  ;;  %1644 = vmatprep.mubr.bf16.mxu1 %v3207_v11 }
 0x121   : > { %2318 = vst.msk [vmem:[%s3508_s8] sm:$0xf] %vm2317_vm0, %v2836_v18  ;;  %2382 = vst.msk [vmem:[%s3508_s8 + $0x100] sm:$0xf] %vm2317_vm0, %v2900_v19  ;;  %v2837_v22 = vpack.c.bf16 %v1678_v20, %v1678_v20  ;;  %v2901_v23 = vpack.c.bf16 %v1742_v21, %v1742_v21  ;;  %v3223_v19 = vld [vmem:[%s3322_s30 + $0x1f4] ss:$8 sps:$4 sm:$0xff]  }
 0x122   : > { %v1174_v24 = vpop.f32.mrb[4].mxu0  ;;  %v1430_v25 = vpop.f32.mrb[4].mxu1  ;;  %v3225_v20 = vld [vmem:[%s3322_s30 + $0x3f4] ss:$8 sps:$4 sm:$0xff]  }
 0x123   : > { %2319 = vst.msk [vmem:[%s3508_s8 + $0x4] sm:$0xf] %vm2317_vm0, %v2837_v22  ;;  %2383 = vst.msk [vmem:[%s3508_s8 + $0x104] sm:$0xf] %vm2317_vm0, %v2901_v23  ;;  %v1175_v26 = vadd.f32 %v3494_v63, %v1174_v24  ;;  %v1431_v27 = vadd.f32 %v3494_v63, %v1430_v25  ;;  %v1176_v28 = vpop.f32.mrb[5].mxu0  ;;  %v1432_v29 = vpop.f32.mrb[5].mxu1 }
 0x124   : > { %v1177_v32 = vpop.f32.mrb[6].mxu0  ;;  %v1433_v33 = vpop.f32.mrb[6].mxu1 }
 0x125   : > { %v1679_v36 = vmax.f32 %v1175_v26, 0.0  ;;  %v1743_v37 = vmax.f32 %v1431_v27, 0.0  ;;  %v1178_v38 = vadd.f32 %v3494_v63, %v1177_v32  ;;  %v1434_v39 = vadd.f32 %v3494_v63, %v1433_v33  ;;  %v1179_v40 = vpop.f32.mrb[7].mxu0  ;;  %v1435_v41 = vpop.f32.mrb[7].mxu1 }
 0x126   : > { %v3228_v40 = vld [vmem:[%s3322_s30 + $0x3f0] ss:$8 sps:$4 sm:$0xff]  }
 0x127   : > { %v2838_v42 = vpack.c.bf16 %v1679_v36, %v1679_v36  ;;  %v2902_v43 = vpack.c.bf16 %v1743_v37, %v1743_v37  ;;  %v1680_v44 = vmax.f32 %v1178_v38, 0.0  ;;  %v1744_v45 = vmax.f32 %v1434_v39, 0.0  ;;  %1389 = vmatmul.mubr.bf16.gmra.mrb[112].mxu0 %v3209_v30  ;;  %1645 = vmatmul.mubr.bf16.gmra.mrb[112].mxu1 %v3210_v31  ;;  %v3227_v39 = vld [vmem:[%s3322_s30 + $0x1f0] ss:$8 sps:$4 sm:$0xff]  }
 0x128   : > { %1396 = vmatprep.mubr.bf16.mxu0 %v3211_v34  ;;  %1652 = vmatprep.mubr.bf16.mxu1 %v3213_v35 }
 0x129   : > { %2320 = vst.msk [vmem:[%s3508_s8 + $0x8] sm:$0xf] %vm2317_vm0, %v2838_v42  ;;  %2384 = vst.msk [vmem:[%s3508_s8 + $0x108] sm:$0xf] %vm2317_vm0, %v2902_v43  ;;  %v2839_v46 = vpack.c.bf16 %v1680_v44, %v1680_v44  ;;  %v2903_v47 = vpack.c.bf16 %v1744_v45, %v1744_v45 }
 0x12a   : > { %v1182_v48 = vpop.f32.mrb[8].mxu0  ;;  %v1438_v49 = vpop.f32.mrb[8].mxu1 }
 0x12b   : > { %2321 = vst.msk [vmem:[%s3508_s8 + $0xc] sm:$0xf] %vm2317_vm0, %v2839_v46  ;;  %2385 = vst.msk [vmem:[%s3508_s8 + $0x10c] sm:$0xf] %vm2317_vm0, %v2903_v47  ;;  %v1183_v50 = vadd.f32 %v3494_v63, %v1182_v48  ;;  %v1439_v51 = vadd.f32 %v3494_v63, %v1438_v49  ;;  %v1184_v52 = vpop.f32.mrb[9].mxu0  ;;  %v1440_v53 = vpop.f32.mrb[9].mxu1 }
 0x12c   : > { %v1185_v56 = vpop.f32.mrb[10].mxu0  ;;  %v1441_v57 = vpop.f32.mrb[10].mxu1 }
 0x12d   : > { %v1681_v60 = vmax.f32 %v1183_v50, 0.0  ;;  %v1745_v61 = vmax.f32 %v1439_v51, 0.0  ;;  %v1186_v62 = vadd.f32 %v3494_v63, %v1185_v56  ;;  %v1442_v0 = vadd.f32 %v3494_v63, %v1441_v57  ;;  %v1187_v1 = vpop.f32.mrb[11].mxu0  ;;  %v1443_v2 = vpop.f32.mrb[11].mxu1 }
 0x12f   : > { %v2840_v3 = vpack.c.bf16 %v1681_v60, %v1681_v60  ;;  %v2904_v4 = vpack.c.bf16 %v1745_v61, %v1745_v61  ;;  %v1682_v5 = vmax.f32 %v1186_v62, 0.0  ;;  %v1746_v6 = vmax.f32 %v1442_v0, 0.0  ;;  %1397 = vmatmul.mubr.bf16.gmra.mrb[116].mxu0 %v3215_v54  ;;  %1653 = vmatmul.mubr.bf16.gmra.mrb[116].mxu1 %v3216_v55 }
 0x130   : > { %1404 = vmatprep.mubr.bf16.mxu0 %v3217_v58  ;;  %1660 = vmatprep.mubr.bf16.mxu1 %v3219_v59 }
 0x131   : > { %2322 = vst.msk [vmem:[%s3508_s8 + $0x10] sm:$0xf] %vm2317_vm0, %v2840_v3  ;;  %2386 = vst.msk [vmem:[%s3508_s8 + $0x110] sm:$0xf] %vm2317_vm0, %v2904_v4  ;;  %v2841_v7 = vpack.c.bf16 %v1682_v5, %v1682_v5  ;;  %v2905_v8 = vpack.c.bf16 %v1746_v6, %v1746_v6 }
 0x132   : > { %v1190_v9 = vpop.f32.mrb[12].mxu0  ;;  %v1446_v10 = vpop.f32.mrb[12].mxu1 }
 0x133   : > { %2323 = vst.msk [vmem:[%s3508_s8 + $0x14] sm:$0xf] %vm2317_vm0, %v2841_v7  ;;  %2387 = vst.msk [vmem:[%s3508_s8 + $0x114] sm:$0xf] %vm2317_vm0, %v2905_v8  ;;  %v1191_v11 = vadd.f32 %v3494_v63, %v1190_v9  ;;  %v1447_v12 = vadd.f32 %v3494_v63, %v1446_v10  ;;  %v1192_v13 = vpop.f32.mrb[13].mxu0  ;;  %v1448_v14 = vpop.f32.mrb[13].mxu1 }
 0x134   : > { %v1193_v17 = vpop.f32.mrb[14].mxu0  ;;  %v1449_v18 = vpop.f32.mrb[14].mxu1 }
 0x135   : > { %v1683_v21 = vmax.f32 %v1191_v11, 0.0  ;;  %v1747_v22 = vmax.f32 %v1447_v12, 0.0  ;;  %v1194_v23 = vadd.f32 %v3494_v63, %v1193_v17  ;;  %v1450_v24 = vadd.f32 %v3494_v63, %v1449_v18  ;;  %v1195_v25 = vpop.f32.mrb[15].mxu0  ;;  %v1451_v26 = vpop.f32.mrb[15].mxu1 }
 0x137   : > { %v2842_v27 = vpack.c.bf16 %v1683_v21, %v1683_v21  ;;  %v2906_v28 = vpack.c.bf16 %v1747_v22, %v1747_v22  ;;  %v1684_v29 = vmax.f32 %v1194_v23, 0.0  ;;  %v1748_v30 = vmax.f32 %v1450_v24, 0.0  ;;  %1405 = vmatmul.mubr.bf16.gmra.mrb[120].mxu0 %v3221_v15  ;;  %1661 = vmatmul.mubr.bf16.gmra.mrb[120].mxu1 %v3222_v16 }
 0x138   : > { %1412 = vmatprep.mubr.bf16.mxu0 %v3223_v19  ;;  %1668 = vmatprep.mubr.bf16.mxu1 %v3225_v20 }
 0x139   : > { %2324 = vst.msk [vmem:[%s3508_s8 + $0x18] sm:$0xf] %vm2317_vm0, %v2842_v27  ;;  %2388 = vst.msk [vmem:[%s3508_s8 + $0x118] sm:$0xf] %vm2317_vm0, %v2906_v28  ;;  %v2843_v31 = vpack.c.bf16 %v1684_v29, %v1684_v29  ;;  %v2907_v32 = vpack.c.bf16 %v1748_v30, %v1748_v30 }
 0x13a   : > { %v1198_v33 = vpop.f32.mrb[16].mxu0  ;;  %v1454_v34 = vpop.f32.mrb[16].mxu1 }
 0x13b   : > { %2325 = vst.msk [vmem:[%s3508_s8 + $0x1c] sm:$0xf] %vm2317_vm0, %v2843_v31  ;;  %2389 = vst.msk [vmem:[%s3508_s8 + $0x11c] sm:$0xf] %vm2317_vm0, %v2907_v32  ;;  %v1199_v35 = vadd.f32 %v3494_v63, %v1198_v33  ;;  %v1455_v36 = vadd.f32 %v3494_v63, %v1454_v34  ;;  %v1200_v37 = vpop.f32.mrb[17].mxu0  ;;  %v1456_v38 = vpop.f32.mrb[17].mxu1 }
 0x13c   : > { %v1201_v41 = vpop.f32.mrb[18].mxu0  ;;  %v1457_v42 = vpop.f32.mrb[18].mxu1 }
 0x13d   : > { %v1685_v43 = vmax.f32 %v1199_v35, 0.0  ;;  %v1749_v44 = vmax.f32 %v1455_v36, 0.0  ;;  %v1202_v45 = vadd.f32 %v3494_v63, %v1201_v41  ;;  %v1458_v46 = vadd.f32 %v3494_v63, %v1457_v42  ;;  %v1203_v47 = vpop.f32.mrb[19].mxu0  ;;  %v1459_v48 = vpop.f32.mrb[19].mxu1 }
 0x13f   : > { %v2844_v49 = vpack.c.bf16 %v1685_v43, %v1685_v43  ;;  %v2908_v50 = vpack.c.bf16 %v1749_v44, %v1749_v44  ;;  %v1686_v51 = vmax.f32 %v1202_v45, 0.0  ;;  %v1750_v52 = vmax.f32 %v1458_v46, 0.0  ;;  %1413 = vmatmul.mubr.bf16.gmra.mrb[124].mxu0 %v3227_v39  ;;  %1669 = vmatmul.mubr.bf16.gmra.mrb[124].mxu1 %v3228_v40 }
 0x141   : > { %2326 = vst.msk [vmem:[%s3508_s8 + $0x20] sm:$0xf] %vm2317_vm0, %v2844_v49  ;;  %2390 = vst.msk [vmem:[%s3508_s8 + $0x120] sm:$0xf] %vm2317_vm0, %v2908_v50  ;;  %v2845_v53 = vpack.c.bf16 %v1686_v51, %v1686_v51  ;;  %v2909_v54 = vpack.c.bf16 %v1750_v52, %v1750_v52 }
 0x142   : > { %v1206_v55 = vpop.f32.mrb[20].mxu0  ;;  %v1462_v56 = vpop.f32.mrb[20].mxu1 }
 0x143   : > { %2327 = vst.msk [vmem:[%s3508_s8 + $0x24] sm:$0xf] %vm2317_vm0, %v2845_v53  ;;  %2391 = vst.msk [vmem:[%s3508_s8 + $0x124] sm:$0xf] %vm2317_vm0, %v2909_v54  ;;  %v1207_v57 = vadd.f32 %v3494_v63, %v1206_v55  ;;  %v1463_v58 = vadd.f32 %v3494_v63, %v1462_v56  ;;  %v1208_v59 = vpop.f32.mrb[21].mxu0  ;;  %v1464_v60 = vpop.f32.mrb[21].mxu1 }
 0x144   : > { %v1209_v61 = vpop.f32.mrb[22].mxu0  ;;  %v1465_v62 = vpop.f32.mrb[22].mxu1 }
 0x145   : > { %v1687_v0 = vmax.f32 %v1207_v57, 0.0  ;;  %v1751_v1 = vmax.f32 %v1463_v58, 0.0  ;;  %v1210_v2 = vadd.f32 %v3494_v63, %v1209_v61  ;;  %v1466_v3 = vadd.f32 %v3494_v63, %v1465_v62  ;;  %v1211_v4 = vpop.f32.mrb[23].mxu0  ;;  %v1467_v5 = vpop.f32.mrb[23].mxu1 }
 0x147   : > { %v2846_v6 = vpack.c.bf16 %v1687_v0, %v1687_v0  ;;  %v2910_v7 = vpack.c.bf16 %v1751_v1, %v1751_v1  ;;  %v1688_v8 = vmax.f32 %v1210_v2, 0.0  ;;  %v1752_v9 = vmax.f32 %v1466_v3, 0.0 }
 0x149   : > { %2328 = vst.msk [vmem:[%s3508_s8 + $0x28] sm:$0xf] %vm2317_vm0, %v2846_v6  ;;  %2392 = vst.msk [vmem:[%s3508_s8 + $0x128] sm:$0xf] %vm2317_vm0, %v2910_v7  ;;  %v2847_v10 = vpack.c.bf16 %v1688_v8, %v1688_v8  ;;  %v2911_v11 = vpack.c.bf16 %v1752_v9, %v1752_v9 }
 0x14a   : > { %v1214_v12 = vpop.f32.mrb[24].mxu0  ;;  %v1470_v13 = vpop.f32.mrb[24].mxu1 }
 0x14b   : > { %2329 = vst.msk [vmem:[%s3508_s8 + $0x2c] sm:$0xf] %vm2317_vm0, %v2847_v10  ;;  %2393 = vst.msk [vmem:[%s3508_s8 + $0x12c] sm:$0xf] %vm2317_vm0, %v2911_v11  ;;  %v1215_v14 = vadd.f32 %v3494_v63, %v1214_v12  ;;  %v1471_v15 = vadd.f32 %v3494_v63, %v1470_v13  ;;  %v1216_v16 = vpop.f32.mrb[25].mxu0  ;;  %v1472_v17 = vpop.f32.mrb[25].mxu1 }
 0x14c   : > { %v1217_v18 = vpop.f32.mrb[26].mxu0  ;;  %v1473_v19 = vpop.f32.mrb[26].mxu1 }
 0x14d   : > { %v1689_v20 = vmax.f32 %v1215_v14, 0.0  ;;  %v1753_v21 = vmax.f32 %v1471_v15, 0.0  ;;  %v1218_v22 = vadd.f32 %v3494_v63, %v1217_v18  ;;  %v1474_v23 = vadd.f32 %v3494_v63, %v1473_v19  ;;  %v1219_v24 = vpop.f32.mrb[27].mxu0  ;;  %v1475_v25 = vpop.f32.mrb[27].mxu1 }
 0x14f   : > { %v2848_v26 = vpack.c.bf16 %v1689_v20, %v1689_v20  ;;  %v2912_v27 = vpack.c.bf16 %v1753_v21, %v1753_v21  ;;  %v1690_v28 = vmax.f32 %v1218_v22, 0.0  ;;  %v1754_v29 = vmax.f32 %v1474_v23, 0.0 }
 0x151   : > { %2330 = vst.msk [vmem:[%s3508_s8 + $0x30] sm:$0xf] %vm2317_vm0, %v2848_v26  ;;  %2394 = vst.msk [vmem:[%s3508_s8 + $0x130] sm:$0xf] %vm2317_vm0, %v2912_v27  ;;  %v2849_v30 = vpack.c.bf16 %v1690_v28, %v1690_v28  ;;  %v2913_v31 = vpack.c.bf16 %v1754_v29, %v1754_v29 }
 0x152   : > { %v1222_v32 = vpop.f32.mrb[28].mxu0  ;;  %v1478_v33 = vpop.f32.mrb[28].mxu1 }
 0x153   : > { %2331 = vst.msk [vmem:[%s3508_s8 + $0x34] sm:$0xf] %vm2317_vm0, %v2849_v30  ;;  %2395 = vst.msk [vmem:[%s3508_s8 + $0x134] sm:$0xf] %vm2317_vm0, %v2913_v31  ;;  %v1223_v34 = vadd.f32 %v3494_v63, %v1222_v32  ;;  %v1479_v35 = vadd.f32 %v3494_v63, %v1478_v33  ;;  %v1224_v36 = vpop.f32.mrb[29].mxu0  ;;  %v1480_v37 = vpop.f32.mrb[29].mxu1 }
 0x154   : > { %v1225_v38 = vpop.f32.mrb[30].mxu0  ;;  %v1481_v39 = vpop.f32.mrb[30].mxu1 }
 0x155   : > { %v1691_v40 = vmax.f32 %v1223_v34, 0.0  ;;  %v1755_v41 = vmax.f32 %v1479_v35, 0.0  ;;  %v1226_v42 = vadd.f32 %v3494_v63, %v1225_v38  ;;  %v1482_v43 = vadd.f32 %v3494_v63, %v1481_v39  ;;  %v1227_v44 = vpop.f32.mrb[31].mxu0  ;;  %v1483_v45 = vpop.f32.mrb[31].mxu1 }
 0x157   : > { %v2850_v46 = vpack.c.bf16 %v1691_v40, %v1691_v40  ;;  %v2914_v47 = vpack.c.bf16 %v1755_v41, %v1755_v41  ;;  %v1692_v48 = vmax.f32 %v1226_v42, 0.0  ;;  %v1756_v49 = vmax.f32 %v1482_v43, 0.0 }
 0x159   : > { %2332 = vst.msk [vmem:[%s3508_s8 + $0x38] sm:$0xf] %vm2317_vm0, %v2850_v46  ;;  %2396 = vst.msk [vmem:[%s3508_s8 + $0x138] sm:$0xf] %vm2317_vm0, %v2914_v47  ;;  %v2851_v50 = vpack.c.bf16 %v1692_v48, %v1692_v48  ;;  %v2915_v51 = vpack.c.bf16 %v1756_v49, %v1756_v49 }
 0x15a   : > { %v1230_v52 = vpop.f32.mrb[32].mxu0  ;;  %v1486_v53 = vpop.f32.mrb[32].mxu1 }
 0x15b   : > { %2333 = vst.msk [vmem:[%s3508_s8 + $0x3c] sm:$0xf] %vm2317_vm0, %v2851_v50  ;;  %2397 = vst.msk [vmem:[%s3508_s8 + $0x13c] sm:$0xf] %vm2317_vm0, %v2915_v51  ;;  %v1231_v54 = vadd.f32 %v3494_v63, %v1230_v52  ;;  %v1487_v55 = vadd.f32 %v3494_v63, %v1486_v53  ;;  %v1232_v56 = vpop.f32.mrb[33].mxu0  ;;  %v1488_v57 = vpop.f32.mrb[33].mxu1 }
 0x15c   : > { %v1233_v58 = vpop.f32.mrb[34].mxu0  ;;  %v1489_v59 = vpop.f32.mrb[34].mxu1 }
 0x15d   : > { %v1693_v60 = vmax.f32 %v1231_v54, 0.0  ;;  %v1757_v61 = vmax.f32 %v1487_v55, 0.0  ;;  %v1234_v62 = vadd.f32 %v3494_v63, %v1233_v58  ;;  %v1490_v0 = vadd.f32 %v3494_v63, %v1489_v59  ;;  %v1235_v1 = vpop.f32.mrb[35].mxu0  ;;  %v1491_v2 = vpop.f32.mrb[35].mxu1 }
 0x15f   : > { %v2852_v3 = vpack.c.bf16 %v1693_v60, %v1693_v60  ;;  %v2916_v4 = vpack.c.bf16 %v1757_v61, %v1757_v61  ;;  %v1694_v5 = vmax.f32 %v1234_v62, 0.0  ;;  %v1758_v6 = vmax.f32 %v1490_v0, 0.0 }
 0x161   : > { %2334 = vst.msk [vmem:[%s3508_s8 + $0x40] sm:$0xf] %vm2317_vm0, %v2852_v3  ;;  %2398 = vst.msk [vmem:[%s3508_s8 + $0x140] sm:$0xf] %vm2317_vm0, %v2916_v4  ;;  %v2853_v7 = vpack.c.bf16 %v1694_v5, %v1694_v5  ;;  %v2917_v8 = vpack.c.bf16 %v1758_v6, %v1758_v6 }
 0x162   : > { %v1238_v9 = vpop.f32.mrb[36].mxu0  ;;  %v1494_v10 = vpop.f32.mrb[36].mxu1 }
 0x163   : > { %2335 = vst.msk [vmem:[%s3508_s8 + $0x44] sm:$0xf] %vm2317_vm0, %v2853_v7  ;;  %2399 = vst.msk [vmem:[%s3508_s8 + $0x144] sm:$0xf] %vm2317_vm0, %v2917_v8  ;;  %v1239_v11 = vadd.f32 %v3494_v63, %v1238_v9  ;;  %v1495_v12 = vadd.f32 %v3494_v63, %v1494_v10  ;;  %v1240_v13 = vpop.f32.mrb[37].mxu0  ;;  %v1496_v14 = vpop.f32.mrb[37].mxu1 }
 0x164   : > { %v1241_v15 = vpop.f32.mrb[38].mxu0  ;;  %v1497_v16 = vpop.f32.mrb[38].mxu1 }
 0x165   : > { %v1695_v17 = vmax.f32 %v1239_v11, 0.0  ;;  %v1759_v18 = vmax.f32 %v1495_v12, 0.0  ;;  %v1242_v19 = vadd.f32 %v3494_v63, %v1241_v15  ;;  %v1498_v20 = vadd.f32 %v3494_v63, %v1497_v16  ;;  %v1243_v21 = vpop.f32.mrb[39].mxu0  ;;  %v1499_v22 = vpop.f32.mrb[39].mxu1 }
 0x167   : > { %v2854_v23 = vpack.c.bf16 %v1695_v17, %v1695_v17  ;;  %v2918_v24 = vpack.c.bf16 %v1759_v18, %v1759_v18  ;;  %v1696_v25 = vmax.f32 %v1242_v19, 0.0  ;;  %v1760_v26 = vmax.f32 %v1498_v20, 0.0 }
 0x169   : > { %2336 = vst.msk [vmem:[%s3508_s8 + $0x48] sm:$0xf] %vm2317_vm0, %v2854_v23  ;;  %2400 = vst.msk [vmem:[%s3508_s8 + $0x148] sm:$0xf] %vm2317_vm0, %v2918_v24  ;;  %v2855_v27 = vpack.c.bf16 %v1696_v25, %v1696_v25  ;;  %v2919_v28 = vpack.c.bf16 %v1760_v26, %v1760_v26 }
 0x16a   : > { %v1246_v29 = vpop.f32.mrb[40].mxu0  ;;  %v1502_v30 = vpop.f32.mrb[40].mxu1 }
 0x16b   : > { %2337 = vst.msk [vmem:[%s3508_s8 + $0x4c] sm:$0xf] %vm2317_vm0, %v2855_v27  ;;  %2401 = vst.msk [vmem:[%s3508_s8 + $0x14c] sm:$0xf] %vm2317_vm0, %v2919_v28  ;;  %v1247_v31 = vadd.f32 %v3494_v63, %v1246_v29  ;;  %v1503_v32 = vadd.f32 %v3494_v63, %v1502_v30  ;;  %v1248_v33 = vpop.f32.mrb[41].mxu0  ;;  %v1504_v34 = vpop.f32.mrb[41].mxu1 }
 0x16c   : > { %v1249_v35 = vpop.f32.mrb[42].mxu0  ;;  %v1505_v36 = vpop.f32.mrb[42].mxu1 }
 0x16d   : > { %v1697_v37 = vmax.f32 %v1247_v31, 0.0  ;;  %v1761_v38 = vmax.f32 %v1503_v32, 0.0  ;;  %v1250_v39 = vadd.f32 %v3494_v63, %v1249_v35  ;;  %v1506_v40 = vadd.f32 %v3494_v63, %v1505_v36  ;;  %v1251_v41 = vpop.f32.mrb[43].mxu0  ;;  %v1507_v42 = vpop.f32.mrb[43].mxu1 }
 0x16f   : > { %v2856_v43 = vpack.c.bf16 %v1697_v37, %v1697_v37  ;;  %v2920_v44 = vpack.c.bf16 %v1761_v38, %v1761_v38  ;;  %v1698_v45 = vmax.f32 %v1250_v39, 0.0  ;;  %v1762_v46 = vmax.f32 %v1506_v40, 0.0 }
 0x171   : > { %2338 = vst.msk [vmem:[%s3508_s8 + $0x50] sm:$0xf] %vm2317_vm0, %v2856_v43  ;;  %2402 = vst.msk [vmem:[%s3508_s8 + $0x150] sm:$0xf] %vm2317_vm0, %v2920_v44  ;;  %v2857_v47 = vpack.c.bf16 %v1698_v45, %v1698_v45  ;;  %v2921_v48 = vpack.c.bf16 %v1762_v46, %v1762_v46 }
 0x172   : > { %v1254_v49 = vpop.f32.mrb[44].mxu0  ;;  %v1510_v50 = vpop.f32.mrb[44].mxu1 }
 0x173   : > { %2339 = vst.msk [vmem:[%s3508_s8 + $0x54] sm:$0xf] %vm2317_vm0, %v2857_v47  ;;  %2403 = vst.msk [vmem:[%s3508_s8 + $0x154] sm:$0xf] %vm2317_vm0, %v2921_v48  ;;  %v1255_v51 = vadd.f32 %v3494_v63, %v1254_v49  ;;  %v1511_v52 = vadd.f32 %v3494_v63, %v1510_v50  ;;  %v1256_v53 = vpop.f32.mrb[45].mxu0  ;;  %v1512_v54 = vpop.f32.mrb[45].mxu1 }
 0x174   : > { %v1257_v55 = vpop.f32.mrb[46].mxu0  ;;  %v1513_v56 = vpop.f32.mrb[46].mxu1 }
 0x175   : > { %v1699_v57 = vmax.f32 %v1255_v51, 0.0  ;;  %v1763_v58 = vmax.f32 %v1511_v52, 0.0  ;;  %v1258_v59 = vadd.f32 %v3494_v63, %v1257_v55  ;;  %v1514_v60 = vadd.f32 %v3494_v63, %v1513_v56  ;;  %v1259_v61 = vpop.f32.mrb[47].mxu0  ;;  %v1515_v62 = vpop.f32.mrb[47].mxu1 }
 0x177   : > { %v2858_v0 = vpack.c.bf16 %v1699_v57, %v1699_v57  ;;  %v2922_v1 = vpack.c.bf16 %v1763_v58, %v1763_v58  ;;  %v1700_v2 = vmax.f32 %v1258_v59, 0.0  ;;  %v1764_v3 = vmax.f32 %v1514_v60, 0.0 }
 0x179   : > { %2340 = vst.msk [vmem:[%s3508_s8 + $0x58] sm:$0xf] %vm2317_vm0, %v2858_v0  ;;  %2404 = vst.msk [vmem:[%s3508_s8 + $0x158] sm:$0xf] %vm2317_vm0, %v2922_v1  ;;  %v2859_v4 = vpack.c.bf16 %v1700_v2, %v1700_v2  ;;  %v2923_v5 = vpack.c.bf16 %v1764_v3, %v1764_v3 }
 0x17a   : > { %v1262_v6 = vpop.f32.mrb[48].mxu0  ;;  %v1518_v7 = vpop.f32.mrb[48].mxu1 }
 0x17b   : > { %2341 = vst.msk [vmem:[%s3508_s8 + $0x5c] sm:$0xf] %vm2317_vm0, %v2859_v4  ;;  %2405 = vst.msk [vmem:[%s3508_s8 + $0x15c] sm:$0xf] %vm2317_vm0, %v2923_v5  ;;  %v1263_v8 = vadd.f32 %v3494_v63, %v1262_v6  ;;  %v1519_v9 = vadd.f32 %v3494_v63, %v1518_v7  ;;  %v1264_v10 = vpop.f32.mrb[49].mxu0  ;;  %v1520_v11 = vpop.f32.mrb[49].mxu1 }
 0x17c   : > { %v1265_v12 = vpop.f32.mrb[50].mxu0  ;;  %v1521_v13 = vpop.f32.mrb[50].mxu1 }
 0x17d   : > { %v1701_v14 = vmax.f32 %v1263_v8, 0.0  ;;  %v1765_v15 = vmax.f32 %v1519_v9, 0.0  ;;  %v1266_v16 = vadd.f32 %v3494_v63, %v1265_v12  ;;  %v1522_v17 = vadd.f32 %v3494_v63, %v1521_v13  ;;  %v1267_v18 = vpop.f32.mrb[51].mxu0  ;;  %v1523_v19 = vpop.f32.mrb[51].mxu1 }
 0x17f   : > { %v2860_v20 = vpack.c.bf16 %v1701_v14, %v1701_v14  ;;  %v2924_v21 = vpack.c.bf16 %v1765_v15, %v1765_v15  ;;  %v1702_v22 = vmax.f32 %v1266_v16, 0.0  ;;  %v1766_v23 = vmax.f32 %v1522_v17, 0.0 }
 0x181   : > { %2342 = vst.msk [vmem:[%s3508_s8 + $0x60] sm:$0xf] %vm2317_vm0, %v2860_v20  ;;  %2406 = vst.msk [vmem:[%s3508_s8 + $0x160] sm:$0xf] %vm2317_vm0, %v2924_v21  ;;  %v2861_v24 = vpack.c.bf16 %v1702_v22, %v1702_v22  ;;  %v2925_v25 = vpack.c.bf16 %v1766_v23, %v1766_v23 }
 0x182   : > { %v1270_v26 = vpop.f32.mrb[52].mxu0  ;;  %v1526_v27 = vpop.f32.mrb[52].mxu1 }
 0x183   : > { %2343 = vst.msk [vmem:[%s3508_s8 + $0x64] sm:$0xf] %vm2317_vm0, %v2861_v24  ;;  %2407 = vst.msk [vmem:[%s3508_s8 + $0x164] sm:$0xf] %vm2317_vm0, %v2925_v25  ;;  %v1271_v28 = vadd.f32 %v3494_v63, %v1270_v26  ;;  %v1527_v29 = vadd.f32 %v3494_v63, %v1526_v27  ;;  %v1272_v30 = vpop.f32.mrb[53].mxu0  ;;  %v1528_v31 = vpop.f32.mrb[53].mxu1 }
 0x184   : > { %v1273_v32 = vpop.f32.mrb[54].mxu0  ;;  %v1529_v33 = vpop.f32.mrb[54].mxu1 }
 0x185   : > { %v1703_v34 = vmax.f32 %v1271_v28, 0.0  ;;  %v1767_v35 = vmax.f32 %v1527_v29, 0.0  ;;  %v1274_v36 = vadd.f32 %v3494_v63, %v1273_v32  ;;  %v1530_v37 = vadd.f32 %v3494_v63, %v1529_v33  ;;  %v1275_v38 = vpop.f32.mrb[55].mxu0  ;;  %v1531_v39 = vpop.f32.mrb[55].mxu1 }
 0x187   : > { %v2862_v40 = vpack.c.bf16 %v1703_v34, %v1703_v34  ;;  %v2926_v41 = vpack.c.bf16 %v1767_v35, %v1767_v35  ;;  %v1704_v42 = vmax.f32 %v1274_v36, 0.0  ;;  %v1768_v43 = vmax.f32 %v1530_v37, 0.0 }
 0x189   : > { %2344 = vst.msk [vmem:[%s3508_s8 + $0x68] sm:$0xf] %vm2317_vm0, %v2862_v40  ;;  %2408 = vst.msk [vmem:[%s3508_s8 + $0x168] sm:$0xf] %vm2317_vm0, %v2926_v41  ;;  %v2863_v44 = vpack.c.bf16 %v1704_v42, %v1704_v42  ;;  %v2927_v45 = vpack.c.bf16 %v1768_v43, %v1768_v43 }
 0x18a   : > { %v1278_v46 = vpop.f32.mrb[56].mxu0  ;;  %v1534_v47 = vpop.f32.mrb[56].mxu1 }
 0x18b   : > { %2345 = vst.msk [vmem:[%s3508_s8 + $0x6c] sm:$0xf] %vm2317_vm0, %v2863_v44  ;;  %2409 = vst.msk [vmem:[%s3508_s8 + $0x16c] sm:$0xf] %vm2317_vm0, %v2927_v45  ;;  %v1279_v48 = vadd.f32 %v3494_v63, %v1278_v46  ;;  %v1535_v49 = vadd.f32 %v3494_v63, %v1534_v47  ;;  %v1280_v50 = vpop.f32.mrb[57].mxu0  ;;  %v1536_v51 = vpop.f32.mrb[57].mxu1 }
 0x18c   : > { %v1281_v52 = vpop.f32.mrb[58].mxu0  ;;  %v1537_v53 = vpop.f32.mrb[58].mxu1 }
 0x18d   : > { %v1705_v54 = vmax.f32 %v1279_v48, 0.0  ;;  %v1769_v55 = vmax.f32 %v1535_v49, 0.0  ;;  %v1282_v56 = vadd.f32 %v3494_v63, %v1281_v52  ;;  %v1538_v57 = vadd.f32 %v3494_v63, %v1537_v53  ;;  %v1283_v58 = vpop.f32.mrb[59].mxu0  ;;  %v1539_v59 = vpop.f32.mrb[59].mxu1 }
 0x18f   : > { %v2864_v60 = vpack.c.bf16 %v1705_v54, %v1705_v54  ;;  %v2928_v61 = vpack.c.bf16 %v1769_v55, %v1769_v55  ;;  %v1706_v62 = vmax.f32 %v1282_v56, 0.0  ;;  %v1770_v0 = vmax.f32 %v1538_v57, 0.0 }
 0x191   : > { %2346 = vst.msk [vmem:[%s3508_s8 + $0x70] sm:$0xf] %vm2317_vm0, %v2864_v60  ;;  %2410 = vst.msk [vmem:[%s3508_s8 + $0x170] sm:$0xf] %vm2317_vm0, %v2928_v61  ;;  %v2865_v1 = vpack.c.bf16 %v1706_v62, %v1706_v62  ;;  %v2929_v2 = vpack.c.bf16 %v1770_v0, %v1770_v0 }
 0x192   : > { %v1286_v3 = vpop.f32.mrb[60].mxu0  ;;  %v1542_v4 = vpop.f32.mrb[60].mxu1 }
 0x193   : > { %2347 = vst.msk [vmem:[%s3508_s8 + $0x74] sm:$0xf] %vm2317_vm0, %v2865_v1  ;;  %2411 = vst.msk [vmem:[%s3508_s8 + $0x174] sm:$0xf] %vm2317_vm0, %v2929_v2  ;;  %v1287_v5 = vadd.f32 %v3494_v63, %v1286_v3  ;;  %v1543_v6 = vadd.f32 %v3494_v63, %v1542_v4  ;;  %v1288_v7 = vpop.f32.mrb[61].mxu0  ;;  %v1544_v8 = vpop.f32.mrb[61].mxu1 }
 0x194   : > { %v1289_v9 = vpop.f32.mrb[62].mxu0  ;;  %v1545_v10 = vpop.f32.mrb[62].mxu1 }
 0x195   : > { %v1707_v11 = vmax.f32 %v1287_v5, 0.0  ;;  %v1771_v12 = vmax.f32 %v1543_v6, 0.0  ;;  %v1290_v13 = vadd.f32 %v3494_v63, %v1289_v9  ;;  %v1546_v14 = vadd.f32 %v3494_v63, %v1545_v10  ;;  %v1291_v15 = vpop.f32.mrb[63].mxu0  ;;  %v1547_v16 = vpop.f32.mrb[63].mxu1 }
 0x197   : > { %v2866_v17 = vpack.c.bf16 %v1707_v11, %v1707_v11  ;;  %v2930_v18 = vpack.c.bf16 %v1771_v12, %v1771_v12  ;;  %v1708_v19 = vmax.f32 %v1290_v13, 0.0  ;;  %v1772_v20 = vmax.f32 %v1546_v14, 0.0 }
 0x199   : > { %2348 = vst.msk [vmem:[%s3508_s8 + $0x78] sm:$0xf] %vm2317_vm0, %v2866_v17  ;;  %2412 = vst.msk [vmem:[%s3508_s8 + $0x178] sm:$0xf] %vm2317_vm0, %v2930_v18  ;;  %v2867_v21 = vpack.c.bf16 %v1708_v19, %v1708_v19  ;;  %v2931_v22 = vpack.c.bf16 %v1772_v20, %v1772_v20 }
 0x19a   : > { %v1294_v23 = vpop.f32.mrb[64].mxu0  ;;  %v1550_v24 = vpop.f32.mrb[64].mxu1 }
 0x19b   : > { %2349 = vst.msk [vmem:[%s3508_s8 + $0x7c] sm:$0xf] %vm2317_vm0, %v2867_v21  ;;  %2413 = vst.msk [vmem:[%s3508_s8 + $0x17c] sm:$0xf] %vm2317_vm0, %v2931_v22  ;;  %v1295_v25 = vadd.f32 %v3494_v63, %v1294_v23  ;;  %v1551_v26 = vadd.f32 %v3494_v63, %v1550_v24  ;;  %v1296_v27 = vpop.f32.mrb[65].mxu0  ;;  %v1552_v28 = vpop.f32.mrb[65].mxu1 }
 0x19c   : > { %v1297_v29 = vpop.f32.mrb[66].mxu0  ;;  %v1553_v30 = vpop.f32.mrb[66].mxu1 }
 0x19d   : > { %v1709_v31 = vmax.f32 %v1295_v25, 0.0  ;;  %v1773_v32 = vmax.f32 %v1551_v26, 0.0  ;;  %v1298_v33 = vadd.f32 %v3494_v63, %v1297_v29  ;;  %v1554_v34 = vadd.f32 %v3494_v63, %v1553_v30  ;;  %v1299_v35 = vpop.f32.mrb[67].mxu0  ;;  %v1555_v36 = vpop.f32.mrb[67].mxu1 }
 0x19f   : > { %v2868_v37 = vpack.c.bf16 %v1709_v31, %v1709_v31  ;;  %v2932_v38 = vpack.c.bf16 %v1773_v32, %v1773_v32  ;;  %v1710_v39 = vmax.f32 %v1298_v33, 0.0  ;;  %v1774_v40 = vmax.f32 %v1554_v34, 0.0 }
 0x1a1   : > { %2350 = vst.msk [vmem:[%s3508_s8 + $0x80] sm:$0xf] %vm2317_vm0, %v2868_v37  ;;  %2414 = vst.msk [vmem:[%s3508_s8 + $0x180] sm:$0xf] %vm2317_vm0, %v2932_v38  ;;  %v2869_v41 = vpack.c.bf16 %v1710_v39, %v1710_v39  ;;  %v2933_v42 = vpack.c.bf16 %v1774_v40, %v1774_v40 }
 0x1a2   : > { %v1302_v43 = vpop.f32.mrb[68].mxu0  ;;  %v1558_v44 = vpop.f32.mrb[68].mxu1 }
 0x1a3   : > { %2351 = vst.msk [vmem:[%s3508_s8 + $0x84] sm:$0xf] %vm2317_vm0, %v2869_v41  ;;  %2415 = vst.msk [vmem:[%s3508_s8 + $0x184] sm:$0xf] %vm2317_vm0, %v2933_v42  ;;  %v1303_v45 = vadd.f32 %v3494_v63, %v1302_v43  ;;  %v1559_v46 = vadd.f32 %v3494_v63, %v1558_v44  ;;  %v1304_v47 = vpop.f32.mrb[69].mxu0  ;;  %v1560_v48 = vpop.f32.mrb[69].mxu1 }
 0x1a4   : > { %v1305_v49 = vpop.f32.mrb[70].mxu0  ;;  %v1561_v50 = vpop.f32.mrb[70].mxu1 }
 0x1a5   : > { %v1711_v51 = vmax.f32 %v1303_v45, 0.0  ;;  %v1775_v52 = vmax.f32 %v1559_v46, 0.0  ;;  %v1306_v53 = vadd.f32 %v3494_v63, %v1305_v49  ;;  %v1562_v54 = vadd.f32 %v3494_v63, %v1561_v50  ;;  %v1307_v55 = vpop.f32.mrb[71].mxu0  ;;  %v1563_v56 = vpop.f32.mrb[71].mxu1 }
 0x1a7   : > { %v2870_v57 = vpack.c.bf16 %v1711_v51, %v1711_v51  ;;  %v2934_v58 = vpack.c.bf16 %v1775_v52, %v1775_v52  ;;  %v1712_v59 = vmax.f32 %v1306_v53, 0.0  ;;  %v1776_v60 = vmax.f32 %v1562_v54, 0.0 }
 0x1a9   : > { %2352 = vst.msk [vmem:[%s3508_s8 + $0x88] sm:$0xf] %vm2317_vm0, %v2870_v57  ;;  %2416 = vst.msk [vmem:[%s3508_s8 + $0x188] sm:$0xf] %vm2317_vm0, %v2934_v58  ;;  %v2871_v61 = vpack.c.bf16 %v1712_v59, %v1712_v59  ;;  %v2935_v62 = vpack.c.bf16 %v1776_v60, %v1776_v60 }
 0x1aa   : > { %v1310_v0 = vpop.f32.mrb[72].mxu0  ;;  %v1566_v1 = vpop.f32.mrb[72].mxu1 }
 0x1ab   : > { %2353 = vst.msk [vmem:[%s3508_s8 + $0x8c] sm:$0xf] %vm2317_vm0, %v2871_v61  ;;  %2417 = vst.msk [vmem:[%s3508_s8 + $0x18c] sm:$0xf] %vm2317_vm0, %v2935_v62  ;;  %v1311_v2 = vadd.f32 %v3494_v63, %v1310_v0  ;;  %v1567_v3 = vadd.f32 %v3494_v63, %v1566_v1  ;;  %v1312_v4 = vpop.f32.mrb[73].mxu0  ;;  %v1568_v5 = vpop.f32.mrb[73].mxu1 }
 0x1ac   : > { %v1313_v6 = vpop.f32.mrb[74].mxu0  ;;  %v1569_v7 = vpop.f32.mrb[74].mxu1 }
 0x1ad   : > { %v1713_v8 = vmax.f32 %v1311_v2, 0.0  ;;  %v1777_v9 = vmax.f32 %v1567_v3, 0.0  ;;  %v1314_v10 = vadd.f32 %v3494_v63, %v1313_v6  ;;  %v1570_v11 = vadd.f32 %v3494_v63, %v1569_v7  ;;  %v1315_v12 = vpop.f32.mrb[75].mxu0  ;;  %v1571_v13 = vpop.f32.mrb[75].mxu1 }
 0x1af   : > { %v2872_v14 = vpack.c.bf16 %v1713_v8, %v1713_v8  ;;  %v2936_v15 = vpack.c.bf16 %v1777_v9, %v1777_v9  ;;  %v1714_v16 = vmax.f32 %v1314_v10, 0.0  ;;  %v1778_v17 = vmax.f32 %v1570_v11, 0.0 }
 0x1b1   : > { %2354 = vst.msk [vmem:[%s3508_s8 + $0x90] sm:$0xf] %vm2317_vm0, %v2872_v14  ;;  %2418 = vst.msk [vmem:[%s3508_s8 + $0x190] sm:$0xf] %vm2317_vm0, %v2936_v15  ;;  %v2873_v18 = vpack.c.bf16 %v1714_v16, %v1714_v16  ;;  %v2937_v19 = vpack.c.bf16 %v1778_v17, %v1778_v17 }
 0x1b2   : > { %v1318_v20 = vpop.f32.mrb[76].mxu0  ;;  %v1574_v21 = vpop.f32.mrb[76].mxu1 }
 0x1b3   : > { %2355 = vst.msk [vmem:[%s3508_s8 + $0x94] sm:$0xf] %vm2317_vm0, %v2873_v18  ;;  %2419 = vst.msk [vmem:[%s3508_s8 + $0x194] sm:$0xf] %vm2317_vm0, %v2937_v19  ;;  %v1319_v22 = vadd.f32 %v3494_v63, %v1318_v20  ;;  %v1575_v23 = vadd.f32 %v3494_v63, %v1574_v21  ;;  %v1320_v24 = vpop.f32.mrb[77].mxu0  ;;  %v1576_v25 = vpop.f32.mrb[77].mxu1 }
 0x1b4   : > { %v1321_v26 = vpop.f32.mrb[78].mxu0  ;;  %v1577_v27 = vpop.f32.mrb[78].mxu1 }
 0x1b5   : > { %v1715_v28 = vmax.f32 %v1319_v22, 0.0  ;;  %v1779_v29 = vmax.f32 %v1575_v23, 0.0  ;;  %v1322_v30 = vadd.f32 %v3494_v63, %v1321_v26  ;;  %v1578_v31 = vadd.f32 %v3494_v63, %v1577_v27  ;;  %v1323_v32 = vpop.f32.mrb[79].mxu0  ;;  %v1579_v33 = vpop.f32.mrb[79].mxu1  ;;  %v3763_v63 = vld [vmem:[%s3920_s2] ss:$0 sm:$0xff] }
 0x1b7   : > { %v2874_v34 = vpack.c.bf16 %v1715_v28, %v1715_v28  ;;  %v2938_v35 = vpack.c.bf16 %v1779_v29, %v1779_v29  ;;  %v1716_v36 = vmax.f32 %v1322_v30, 0.0  ;;  %v1780_v37 = vmax.f32 %v1578_v31, 0.0 }
 0x1b9   : > { %2356 = vst.msk [vmem:[%s3508_s8 + $0x98] sm:$0xf] %vm2317_vm0, %v2874_v34  ;;  %2420 = vst.msk [vmem:[%s3508_s8 + $0x198] sm:$0xf] %vm2317_vm0, %v2938_v35  ;;  %v2875_v38 = vpack.c.bf16 %v1716_v36, %v1716_v36  ;;  %v2939_v39 = vpack.c.bf16 %v1780_v37, %v1780_v37 }
 0x1ba   : > { %v1326_v40 = vpop.f32.mrb[80].mxu0  ;;  %v1582_v41 = vpop.f32.mrb[80].mxu1 }
 0x1bb   : > { %2357 = vst.msk [vmem:[%s3508_s8 + $0x9c] sm:$0xf] %vm2317_vm0, %v2875_v38  ;;  %2421 = vst.msk [vmem:[%s3508_s8 + $0x19c] sm:$0xf] %vm2317_vm0, %v2939_v39  ;;  %v1327_v42 = vadd.f32 %v3763_v63, %v1326_v40  ;;  %v1583_v43 = vadd.f32 %v3763_v63, %v1582_v41  ;;  %v1328_v44 = vpop.f32.mrb[81].mxu0  ;;  %v1584_v45 = vpop.f32.mrb[81].mxu1 }
 0x1bc   : > { %v1329_v46 = vpop.f32.mrb[82].mxu0  ;;  %v1585_v47 = vpop.f32.mrb[82].mxu1 }
 0x1bd   : > { %v1717_v48 = vmax.f32 %v1327_v42, 0.0  ;;  %v1781_v49 = vmax.f32 %v1583_v43, 0.0  ;;  %v1330_v50 = vadd.f32 %v3763_v63, %v1329_v46  ;;  %v1586_v51 = vadd.f32 %v3763_v63, %v1585_v47  ;;  %v1331_v52 = vpop.f32.mrb[83].mxu0  ;;  %v1587_v53 = vpop.f32.mrb[83].mxu1 }
 0x1bf   : > { %v2876_v54 = vpack.c.bf16 %v1717_v48, %v1717_v48  ;;  %v2940_v55 = vpack.c.bf16 %v1781_v49, %v1781_v49  ;;  %v1718_v56 = vmax.f32 %v1330_v50, 0.0  ;;  %v1782_v57 = vmax.f32 %v1586_v51, 0.0 }
 0x1c1   : > { %2358 = vst.msk [vmem:[%s3508_s8 + $0xa0] sm:$0xf] %vm2317_vm0, %v2876_v54  ;;  %2422 = vst.msk [vmem:[%s3508_s8 + $0x1a0] sm:$0xf] %vm2317_vm0, %v2940_v55  ;;  %v2877_v58 = vpack.c.bf16 %v1718_v56, %v1718_v56  ;;  %v2941_v59 = vpack.c.bf16 %v1782_v57, %v1782_v57 }
 0x1c2   : > { %v1334_v60 = vpop.f32.mrb[84].mxu0  ;;  %v1590_v61 = vpop.f32.mrb[84].mxu1 }
 0x1c3   : > { %2359 = vst.msk [vmem:[%s3508_s8 + $0xa4] sm:$0xf] %vm2317_vm0, %v2877_v58  ;;  %2423 = vst.msk [vmem:[%s3508_s8 + $0x1a4] sm:$0xf] %vm2317_vm0, %v2941_v59  ;;  %v1335_v62 = vadd.f32 %v3763_v63, %v1334_v60  ;;  %v1591_v0 = vadd.f32 %v3763_v63, %v1590_v61  ;;  %v1336_v1 = vpop.f32.mrb[85].mxu0  ;;  %v1592_v2 = vpop.f32.mrb[85].mxu1 }
 0x1c4   : > { %v1337_v3 = vpop.f32.mrb[86].mxu0  ;;  %v1593_v4 = vpop.f32.mrb[86].mxu1 }
 0x1c5   : > { %v1719_v5 = vmax.f32 %v1335_v62, 0.0  ;;  %v1783_v6 = vmax.f32 %v1591_v0, 0.0  ;;  %v1338_v7 = vadd.f32 %v3763_v63, %v1337_v3  ;;  %v1594_v8 = vadd.f32 %v3763_v63, %v1593_v4  ;;  %v1339_v9 = vpop.f32.mrb[87].mxu0  ;;  %v1595_v10 = vpop.f32.mrb[87].mxu1 }
 0x1c7   : > { %v2878_v11 = vpack.c.bf16 %v1719_v5, %v1719_v5  ;;  %v2942_v12 = vpack.c.bf16 %v1783_v6, %v1783_v6  ;;  %v1720_v13 = vmax.f32 %v1338_v7, 0.0  ;;  %v1784_v14 = vmax.f32 %v1594_v8, 0.0 }
 0x1c9   : > { %2360 = vst.msk [vmem:[%s3508_s8 + $0xa8] sm:$0xf] %vm2317_vm0, %v2878_v11  ;;  %2424 = vst.msk [vmem:[%s3508_s8 + $0x1a8] sm:$0xf] %vm2317_vm0, %v2942_v12  ;;  %v2879_v15 = vpack.c.bf16 %v1720_v13, %v1720_v13  ;;  %v2943_v16 = vpack.c.bf16 %v1784_v14, %v1784_v14 }
 0x1ca   : > { %v1342_v17 = vpop.f32.mrb[88].mxu0  ;;  %v1598_v18 = vpop.f32.mrb[88].mxu1 }
 0x1cb   : > { %2361 = vst.msk [vmem:[%s3508_s8 + $0xac] sm:$0xf] %vm2317_vm0, %v2879_v15  ;;  %2425 = vst.msk [vmem:[%s3508_s8 + $0x1ac] sm:$0xf] %vm2317_vm0, %v2943_v16  ;;  %v1343_v19 = vadd.f32 %v3763_v63, %v1342_v17  ;;  %v1599_v20 = vadd.f32 %v3763_v63, %v1598_v18  ;;  %v1344_v21 = vpop.f32.mrb[89].mxu0  ;;  %v1600_v22 = vpop.f32.mrb[89].mxu1 }
 0x1cc   : > { %v1345_v23 = vpop.f32.mrb[90].mxu0  ;;  %v1601_v24 = vpop.f32.mrb[90].mxu1 }
 0x1cd   : > { %v1721_v25 = vmax.f32 %v1343_v19, 0.0  ;;  %v1785_v26 = vmax.f32 %v1599_v20, 0.0  ;;  %v1346_v27 = vadd.f32 %v3763_v63, %v1345_v23  ;;  %v1602_v28 = vadd.f32 %v3763_v63, %v1601_v24  ;;  %v1347_v29 = vpop.f32.mrb[91].mxu0  ;;  %v1603_v30 = vpop.f32.mrb[91].mxu1 }
 0x1cf   : > { %v2880_v31 = vpack.c.bf16 %v1721_v25, %v1721_v25  ;;  %v2944_v32 = vpack.c.bf16 %v1785_v26, %v1785_v26  ;;  %v1722_v33 = vmax.f32 %v1346_v27, 0.0  ;;  %v1786_v34 = vmax.f32 %v1602_v28, 0.0 }
 0x1d1   : > { %2362 = vst.msk [vmem:[%s3508_s8 + $0xb0] sm:$0xf] %vm2317_vm0, %v2880_v31  ;;  %2426 = vst.msk [vmem:[%s3508_s8 + $0x1b0] sm:$0xf] %vm2317_vm0, %v2944_v32  ;;  %v2881_v35 = vpack.c.bf16 %v1722_v33, %v1722_v33  ;;  %v2945_v36 = vpack.c.bf16 %v1786_v34, %v1786_v34 }
 0x1d2   : > { %v1350_v37 = vpop.f32.mrb[92].mxu0  ;;  %v1606_v38 = vpop.f32.mrb[92].mxu1 }
 0x1d3   : > { %2363 = vst.msk [vmem:[%s3508_s8 + $0xb4] sm:$0xf] %vm2317_vm0, %v2881_v35  ;;  %2427 = vst.msk [vmem:[%s3508_s8 + $0x1b4] sm:$0xf] %vm2317_vm0, %v2945_v36  ;;  %v1351_v39 = vadd.f32 %v3763_v63, %v1350_v37  ;;  %v1607_v40 = vadd.f32 %v3763_v63, %v1606_v38  ;;  %v1352_v41 = vpop.f32.mrb[93].mxu0  ;;  %v1608_v42 = vpop.f32.mrb[93].mxu1 }
 0x1d4   : > { %v1353_v43 = vpop.f32.mrb[94].mxu0  ;;  %v1609_v44 = vpop.f32.mrb[94].mxu1 }
 0x1d5   : > { %v1723_v45 = vmax.f32 %v1351_v39, 0.0  ;;  %v1787_v46 = vmax.f32 %v1607_v40, 0.0  ;;  %v1354_v47 = vadd.f32 %v3763_v63, %v1353_v43  ;;  %v1610_v48 = vadd.f32 %v3763_v63, %v1609_v44  ;;  %v1355_v49 = vpop.f32.mrb[95].mxu0  ;;  %v1611_v50 = vpop.f32.mrb[95].mxu1 }
 0x1d7   : > { %v2882_v51 = vpack.c.bf16 %v1723_v45, %v1723_v45  ;;  %v2946_v52 = vpack.c.bf16 %v1787_v46, %v1787_v46  ;;  %v1724_v53 = vmax.f32 %v1354_v47, 0.0  ;;  %v1788_v54 = vmax.f32 %v1610_v48, 0.0 }
 0x1d9   : > { %2364 = vst.msk [vmem:[%s3508_s8 + $0xb8] sm:$0xf] %vm2317_vm0, %v2882_v51  ;;  %2428 = vst.msk [vmem:[%s3508_s8 + $0x1b8] sm:$0xf] %vm2317_vm0, %v2946_v52  ;;  %v2883_v55 = vpack.c.bf16 %v1724_v53, %v1724_v53  ;;  %v2947_v56 = vpack.c.bf16 %v1788_v54, %v1788_v54 }
 0x1da   : > { %v1358_v57 = vpop.f32.mrb[96].mxu0  ;;  %v1614_v58 = vpop.f32.mrb[96].mxu1 }
 0x1db   : > { %2365 = vst.msk [vmem:[%s3508_s8 + $0xbc] sm:$0xf] %vm2317_vm0, %v2883_v55  ;;  %2429 = vst.msk [vmem:[%s3508_s8 + $0x1bc] sm:$0xf] %vm2317_vm0, %v2947_v56  ;;  %v1359_v59 = vadd.f32 %v3763_v63, %v1358_v57  ;;  %v1615_v60 = vadd.f32 %v3763_v63, %v1614_v58  ;;  %v1360_v61 = vpop.f32.mrb[97].mxu0  ;;  %v1616_v62 = vpop.f32.mrb[97].mxu1 }
 0x1dc   : > { %v1361_v0 = vpop.f32.mrb[98].mxu0  ;;  %v1617_v1 = vpop.f32.mrb[98].mxu1 }
 0x1dd   : > { %v1725_v2 = vmax.f32 %v1359_v59, 0.0  ;;  %v1789_v3 = vmax.f32 %v1615_v60, 0.0  ;;  %v1362_v4 = vadd.f32 %v3763_v63, %v1361_v0  ;;  %v1618_v5 = vadd.f32 %v3763_v63, %v1617_v1  ;;  %v1363_v6 = vpop.f32.mrb[99].mxu0  ;;  %v1619_v7 = vpop.f32.mrb[99].mxu1 }
 0x1df   : > { %v2884_v8 = vpack.c.bf16 %v1725_v2, %v1725_v2  ;;  %v2948_v9 = vpack.c.bf16 %v1789_v3, %v1789_v3  ;;  %v1726_v10 = vmax.f32 %v1362_v4, 0.0  ;;  %v1790_v11 = vmax.f32 %v1618_v5, 0.0 }
 0x1e1   : > { %2366 = vst.msk [vmem:[%s3508_s8 + $0xc0] sm:$0xf] %vm2317_vm0, %v2884_v8  ;;  %2430 = vst.msk [vmem:[%s3508_s8 + $0x1c0] sm:$0xf] %vm2317_vm0, %v2948_v9  ;;  %v2885_v12 = vpack.c.bf16 %v1726_v10, %v1726_v10  ;;  %v2949_v13 = vpack.c.bf16 %v1790_v11, %v1790_v11 }
 0x1e2   : > { %v1366_v14 = vpop.f32.mrb[100].mxu0  ;;  %v1622_v15 = vpop.f32.mrb[100].mxu1 }
 0x1e3   : > { %2367 = vst.msk [vmem:[%s3508_s8 + $0xc4] sm:$0xf] %vm2317_vm0, %v2885_v12  ;;  %2431 = vst.msk [vmem:[%s3508_s8 + $0x1c4] sm:$0xf] %vm2317_vm0, %v2949_v13  ;;  %v1367_v16 = vadd.f32 %v3763_v63, %v1366_v14  ;;  %v1623_v17 = vadd.f32 %v3763_v63, %v1622_v15  ;;  %v1368_v18 = vpop.f32.mrb[101].mxu0  ;;  %v1624_v19 = vpop.f32.mrb[101].mxu1 }
 0x1e4   : > { %v1369_v20 = vpop.f32.mrb[102].mxu0  ;;  %v1625_v21 = vpop.f32.mrb[102].mxu1 }
 0x1e5   : > { %v1727_v22 = vmax.f32 %v1367_v16, 0.0  ;;  %v1791_v23 = vmax.f32 %v1623_v17, 0.0  ;;  %v1370_v24 = vadd.f32 %v3763_v63, %v1369_v20  ;;  %v1626_v25 = vadd.f32 %v3763_v63, %v1625_v21  ;;  %v1371_v26 = vpop.f32.mrb[103].mxu0  ;;  %v1627_v27 = vpop.f32.mrb[103].mxu1 }
 0x1e7   : > { %v2886_v28 = vpack.c.bf16 %v1727_v22, %v1727_v22  ;;  %v2950_v29 = vpack.c.bf16 %v1791_v23, %v1791_v23  ;;  %v1728_v30 = vmax.f32 %v1370_v24, 0.0  ;;  %v1792_v31 = vmax.f32 %v1626_v25, 0.0 }
 0x1e9   : > { %2368 = vst.msk [vmem:[%s3508_s8 + $0xc8] sm:$0xf] %vm2317_vm0, %v2886_v28  ;;  %2432 = vst.msk [vmem:[%s3508_s8 + $0x1c8] sm:$0xf] %vm2317_vm0, %v2950_v29  ;;  %v2887_v32 = vpack.c.bf16 %v1728_v30, %v1728_v30  ;;  %v2951_v33 = vpack.c.bf16 %v1792_v31, %v1792_v31 }
 0x1ea   : > { %v1374_v34 = vpop.f32.mrb[104].mxu0  ;;  %v1630_v35 = vpop.f32.mrb[104].mxu1 }
 0x1eb   : > { %2369 = vst.msk [vmem:[%s3508_s8 + $0xcc] sm:$0xf] %vm2317_vm0, %v2887_v32  ;;  %2433 = vst.msk [vmem:[%s3508_s8 + $0x1cc] sm:$0xf] %vm2317_vm0, %v2951_v33  ;;  %v1375_v36 = vadd.f32 %v3763_v63, %v1374_v34  ;;  %v1631_v37 = vadd.f32 %v3763_v63, %v1630_v35  ;;  %v1376_v38 = vpop.f32.mrb[105].mxu0  ;;  %v1632_v39 = vpop.f32.mrb[105].mxu1 }
 0x1ec   : > { %v1377_v40 = vpop.f32.mrb[106].mxu0  ;;  %v1633_v41 = vpop.f32.mrb[106].mxu1 }
 0x1ed   : > { %v1729_v42 = vmax.f32 %v1375_v36, 0.0  ;;  %v1793_v43 = vmax.f32 %v1631_v37, 0.0  ;;  %v1378_v44 = vadd.f32 %v3763_v63, %v1377_v40  ;;  %v1634_v45 = vadd.f32 %v3763_v63, %v1633_v41  ;;  %v1379_v46 = vpop.f32.mrb[107].mxu0  ;;  %v1635_v47 = vpop.f32.mrb[107].mxu1 }
 0x1ef   : > { %v2888_v48 = vpack.c.bf16 %v1729_v42, %v1729_v42  ;;  %v2952_v49 = vpack.c.bf16 %v1793_v43, %v1793_v43  ;;  %v1730_v50 = vmax.f32 %v1378_v44, 0.0  ;;  %v1794_v51 = vmax.f32 %v1634_v45, 0.0 }
 0x1f1   : > { %2370 = vst.msk [vmem:[%s3508_s8 + $0xd0] sm:$0xf] %vm2317_vm0, %v2888_v48  ;;  %2434 = vst.msk [vmem:[%s3508_s8 + $0x1d0] sm:$0xf] %vm2317_vm0, %v2952_v49  ;;  %v2889_v52 = vpack.c.bf16 %v1730_v50, %v1730_v50  ;;  %v2953_v53 = vpack.c.bf16 %v1794_v51, %v1794_v51 }
 0x1f2   : > { %v1382_v54 = vpop.f32.mrb[108].mxu0  ;;  %v1638_v55 = vpop.f32.mrb[108].mxu1 }
 0x1f3   : > { %2371 = vst.msk [vmem:[%s3508_s8 + $0xd4] sm:$0xf] %vm2317_vm0, %v2889_v52  ;;  %2435 = vst.msk [vmem:[%s3508_s8 + $0x1d4] sm:$0xf] %vm2317_vm0, %v2953_v53  ;;  %v1383_v56 = vadd.f32 %v3763_v63, %v1382_v54  ;;  %v1639_v57 = vadd.f32 %v3763_v63, %v1638_v55  ;;  %v1384_v58 = vpop.f32.mrb[109].mxu0  ;;  %v1640_v59 = vpop.f32.mrb[109].mxu1 }
 0x1f4   : > { %v1385_v60 = vpop.f32.mrb[110].mxu0  ;;  %v1641_v61 = vpop.f32.mrb[110].mxu1 }
 0x1f5   : > { %v1731_v62 = vmax.f32 %v1383_v56, 0.0  ;;  %v1795_v0 = vmax.f32 %v1639_v57, 0.0  ;;  %v1386_v1 = vadd.f32 %v3763_v63, %v1385_v60  ;;  %v1642_v2 = vadd.f32 %v3763_v63, %v1641_v61  ;;  %v1387_v3 = vpop.f32.mrb[111].mxu0  ;;  %v1643_v4 = vpop.f32.mrb[111].mxu1 }
 0x1f7   : > { %v2890_v5 = vpack.c.bf16 %v1731_v62, %v1731_v62  ;;  %v2954_v6 = vpack.c.bf16 %v1795_v0, %v1795_v0  ;;  %v1732_v7 = vmax.f32 %v1386_v1, 0.0  ;;  %v1796_v8 = vmax.f32 %v1642_v2, 0.0 }
 0x1f9   : > { %2372 = vst.msk [vmem:[%s3508_s8 + $0xd8] sm:$0xf] %vm2317_vm0, %v2890_v5  ;;  %2436 = vst.msk [vmem:[%s3508_s8 + $0x1d8] sm:$0xf] %vm2317_vm0, %v2954_v6  ;;  %v2891_v9 = vpack.c.bf16 %v1732_v7, %v1732_v7  ;;  %v2955_v10 = vpack.c.bf16 %v1796_v8, %v1796_v8 }
 0x1fa   : > { %v1390_v11 = vpop.f32.mrb[112].mxu0  ;;  %v1646_v12 = vpop.f32.mrb[112].mxu1 }
 0x1fb   : > { %2373 = vst.msk [vmem:[%s3508_s8 + $0xdc] sm:$0xf] %vm2317_vm0, %v2891_v9  ;;  %2437 = vst.msk [vmem:[%s3508_s8 + $0x1dc] sm:$0xf] %vm2317_vm0, %v2955_v10  ;;  %v1391_v13 = vadd.f32 %v3763_v63, %v1390_v11  ;;  %v1647_v14 = vadd.f32 %v3763_v63, %v1646_v12  ;;  %v1392_v15 = vpop.f32.mrb[113].mxu0  ;;  %v1648_v16 = vpop.f32.mrb[113].mxu1 }
 0x1fc   : > { %v1393_v17 = vpop.f32.mrb[114].mxu0  ;;  %v1649_v18 = vpop.f32.mrb[114].mxu1 }
 0x1fd   : > { %v1733_v19 = vmax.f32 %v1391_v13, 0.0  ;;  %v1797_v20 = vmax.f32 %v1647_v14, 0.0  ;;  %v1394_v21 = vadd.f32 %v3763_v63, %v1393_v17  ;;  %v1650_v22 = vadd.f32 %v3763_v63, %v1649_v18  ;;  %v1395_v23 = vpop.f32.mrb[115].mxu0  ;;  %v1651_v24 = vpop.f32.mrb[115].mxu1 }
 0x1ff   : > { %v2892_v25 = vpack.c.bf16 %v1733_v19, %v1733_v19  ;;  %v2956_v26 = vpack.c.bf16 %v1797_v20, %v1797_v20  ;;  %v1734_v27 = vmax.f32 %v1394_v21, 0.0  ;;  %v1798_v28 = vmax.f32 %v1650_v22, 0.0 }
 0x201   : > { %2374 = vst.msk [vmem:[%s3508_s8 + $0xe0] sm:$0xf] %vm2317_vm0, %v2892_v25  ;;  %2438 = vst.msk [vmem:[%s3508_s8 + $0x1e0] sm:$0xf] %vm2317_vm0, %v2956_v26  ;;  %v2893_v29 = vpack.c.bf16 %v1734_v27, %v1734_v27  ;;  %v2957_v30 = vpack.c.bf16 %v1798_v28, %v1798_v28 }
 0x202   : > { %v1398_v31 = vpop.f32.mrb[116].mxu0  ;;  %v1654_v32 = vpop.f32.mrb[116].mxu1 }
 0x203   : > { %2375 = vst.msk [vmem:[%s3508_s8 + $0xe4] sm:$0xf] %vm2317_vm0, %v2893_v29  ;;  %2439 = vst.msk [vmem:[%s3508_s8 + $0x1e4] sm:$0xf] %vm2317_vm0, %v2957_v30  ;;  %v1399_v33 = vadd.f32 %v3763_v63, %v1398_v31  ;;  %v1655_v34 = vadd.f32 %v3763_v63, %v1654_v32  ;;  %v1400_v35 = vpop.f32.mrb[117].mxu0  ;;  %v1656_v36 = vpop.f32.mrb[117].mxu1 }
 0x204   : > { %v1401_v37 = vpop.f32.mrb[118].mxu0  ;;  %v1657_v38 = vpop.f32.mrb[118].mxu1 }
 0x205   : > { %v1735_v39 = vmax.f32 %v1399_v33, 0.0  ;;  %v1799_v40 = vmax.f32 %v1655_v34, 0.0  ;;  %v1402_v41 = vadd.f32 %v3763_v63, %v1401_v37  ;;  %v1658_v42 = vadd.f32 %v3763_v63, %v1657_v38  ;;  %v1403_v43 = vpop.f32.mrb[119].mxu0  ;;  %v1659_v44 = vpop.f32.mrb[119].mxu1 }
 0x207   : > { %v2894_v45 = vpack.c.bf16 %v1735_v39, %v1735_v39  ;;  %v2958_v46 = vpack.c.bf16 %v1799_v40, %v1799_v40  ;;  %v1736_v47 = vmax.f32 %v1402_v41, 0.0  ;;  %v1800_v48 = vmax.f32 %v1658_v42, 0.0 }
 0x209   : > { %2376 = vst.msk [vmem:[%s3508_s8 + $0xe8] sm:$0xf] %vm2317_vm0, %v2894_v45  ;;  %2440 = vst.msk [vmem:[%s3508_s8 + $0x1e8] sm:$0xf] %vm2317_vm0, %v2958_v46  ;;  %v2895_v49 = vpack.c.bf16 %v1736_v47, %v1736_v47  ;;  %v2959_v50 = vpack.c.bf16 %v1800_v48, %v1800_v48 }
 0x20a   : > { %v1406_v51 = vpop.f32.mrb[120].mxu0  ;;  %v1662_v52 = vpop.f32.mrb[120].mxu1 }
 0x20b   : > { %2377 = vst.msk [vmem:[%s3508_s8 + $0xec] sm:$0xf] %vm2317_vm0, %v2895_v49  ;;  %2441 = vst.msk [vmem:[%s3508_s8 + $0x1ec] sm:$0xf] %vm2317_vm0, %v2959_v50  ;;  %v1407_v53 = vadd.f32 %v3763_v63, %v1406_v51  ;;  %v1663_v54 = vadd.f32 %v3763_v63, %v1662_v52  ;;  %v1408_v55 = vpop.f32.mrb[121].mxu0  ;;  %v1664_v56 = vpop.f32.mrb[121].mxu1 }
 0x20c   : > { %v1409_v57 = vpop.f32.mrb[122].mxu0  ;;  %v1665_v58 = vpop.f32.mrb[122].mxu1 }
 0x20d   : > { %v1737_v59 = vmax.f32 %v1407_v53, 0.0  ;;  %v1801_v60 = vmax.f32 %v1663_v54, 0.0  ;;  %v1410_v61 = vadd.f32 %v3763_v63, %v1409_v57  ;;  %v1666_v62 = vadd.f32 %v3763_v63, %v1665_v58  ;;  %v1411_v0 = vpop.f32.mrb[123].mxu0  ;;  %v1667_v1 = vpop.f32.mrb[123].mxu1 }
 0x20f   : > { %v2896_v2 = vpack.c.bf16 %v1737_v59, %v1737_v59  ;;  %v2960_v3 = vpack.c.bf16 %v1801_v60, %v1801_v60  ;;  %v1738_v4 = vmax.f32 %v1410_v61, 0.0  ;;  %v1802_v5 = vmax.f32 %v1666_v62, 0.0 }
 0x211   : > { %2378 = vst.msk [vmem:[%s3508_s8 + $0xf0] sm:$0xf] %vm2317_vm0, %v2896_v2  ;;  %2442 = vst.msk [vmem:[%s3508_s8 + $0x1f0] sm:$0xf] %vm2317_vm0, %v2960_v3  ;;  %v2897_v6 = vpack.c.bf16 %v1738_v4, %v1738_v4  ;;  %v2961_v7 = vpack.c.bf16 %v1802_v5, %v1802_v5 }
 0x212   : > { %v1414_v8 = vpop.f32.mrb[124].mxu0  ;;  %v1670_v9 = vpop.f32.mrb[124].mxu1 }
 0x213   : > { %2379 = vst.msk [vmem:[%s3508_s8 + $0xf4] sm:$0xf] %vm2317_vm0, %v2897_v6  ;;  %2443 = vst.msk [vmem:[%s3508_s8 + $0x1f4] sm:$0xf] %vm2317_vm0, %v2961_v7  ;;  %v1415_v10 = vadd.f32 %v3763_v63, %v1414_v8  ;;  %v1671_v11 = vadd.f32 %v3763_v63, %v1670_v9  ;;  %v1416_v12 = vpop.f32.mrb[125].mxu0  ;;  %v1672_v13 = vpop.f32.mrb[125].mxu1 }
 0x214   : > { %v1417_v14 = vpop.f32.mrb[126].mxu0  ;;  %v1673_v15 = vpop.f32.mrb[126].mxu1 }
 0x215   : > { %v1739_v16 = vmax.f32 %v1415_v10, 0.0  ;;  %v1803_v17 = vmax.f32 %v1671_v11, 0.0  ;;  %v1418_v18 = vadd.f32 %v3763_v63, %v1417_v14  ;;  %v1674_v19 = vadd.f32 %v3763_v63, %v1673_v15  ;;  %v1419_v20 = vpop.f32.mrb[127].mxu0  ;;  %v1675_v21 = vpop.f32.mrb[127].mxu1 }
 0x217   : > { %v2898_v22 = vpack.c.bf16 %v1739_v16, %v1739_v16  ;;  %v2962_v23 = vpack.c.bf16 %v1803_v17, %v1803_v17  ;;  %v1740_v24 = vmax.f32 %v1418_v18, 0.0  ;;  %v1804_v25 = vmax.f32 %v1674_v19, 0.0 }
 0x219   : > { %2380 = vst.msk [vmem:[%s3508_s8 + $0xf8] sm:$0xf] %vm2317_vm0, %v2898_v22  ;;  %2444 = vst.msk [vmem:[%s3508_s8 + $0x1f8] sm:$0xf] %vm2317_vm0, %v2962_v23  ;;  %v2899_v26 = vpack.c.bf16 %v1740_v24, %v1740_v24  ;;  %v2963_v27 = vpack.c.bf16 %v1804_v25, %v1804_v25 }
 0x21b   : > { %2381 = vst.msk [vmem:[%s3508_s8 + $0xfc] sm:$0xf] %vm2317_vm0, %v2899_v26  ;;  %2445 = vst.msk [vmem:[%s3508_s8 + $0x1fc] sm:$0xf] %vm2317_vm0, %v2963_v27 }
 0x21c PF: > { %s13_s14 = sadd.s32 1, %s3252_s14   ;;  %s3922_s12 = smov %s3248_s13 }
 0x21d   : > { %p10_p5 = scmp.ge.s32.totalorder %s13_s14, 4   ;;  %s3923_s13 = smov %s3925_s15 }
 0x21f   :  { %12 = sbr.rel (!%p10_p5) target bundleno = 2 (0x2), region = 68 }

// kernel: _stem_forward.3
= control target key start
LH: loop header
LB: loop body
LE: loop exit
PB: predicated region body
PF: predicated region fallthrough
CT: control target
= control target key end

     0   :  { %s677_s0 = inlined_call_operand.vmem [shape: bf16[256,128], index: 0, kind: input, shape index: {}]   ;;  %s678_s1 = inlined_call_operand.vmem [shape: bf16[256,128], index: 1, kind: input, shape index: {}]   ;;  %s679_s2 = inlined_call_operand.vmem [shape: bf16[256,128], index: 2, kind: input, shape index: {}]   ;;  %s680_s3 = inlined_call_operand.vmem [shape: bf16[256,128], index: 3, kind: output, shape index: {}]  }
   0x1   :  { %v14_v0 = vld [vmem:[%s677_s0] sm:$0xf]  ;;  %v15_v1 = vld [vmem:[%s677_s0 + $0x4] sm:$0xf]  ;;  %v16_v8 = vld [vmem:[%s677_s0 + $0x8] sm:$0xf] }
   0x2   :  { %v46_v2 = vld [vmem:[%s678_s1] sm:$0xf]  ;;  %v47_v3 = vld [vmem:[%s678_s1 + $0x4] sm:$0xf]  ;;  %v17_v9 = vld [vmem:[%s677_s0 + $0xc] sm:$0xf] }
   0x3   :  { %v78_v4 = vmax.bf16 %v46_v2, %v14_v0  ;;  %v110_v5 = vld [vmem:[%s679_s2] sm:$0xf]  ;;  %v111_v6 = vld [vmem:[%s679_s2 + $0x4] sm:$0xf]  ;;  %v79_v7 = vmax.bf16 %v47_v3, %v15_v1  ;;  %v48_v10 = vld [vmem:[%s678_s1 + $0x8] sm:$0xf] }
   0x4   :  { %v49_v12 = vld [vmem:[%s678_s1 + $0xc] sm:$0xf]  ;;  %v80_v13 = vmax.bf16 %v48_v10, %v16_v8  ;;  %v112_v14 = vld [vmem:[%s679_s2 + $0x8] sm:$0xf]  ;;  %v18_v18 = vld [vmem:[%s677_s0 + $0x10] sm:$0xf] }
   0x5   :  { %v142_v11 = vmax.bf16 %v110_v5, %v78_v4  ;;  %v113_v15 = vld [vmem:[%s679_s2 + $0xc] sm:$0xf]  ;;  %v143_v16 = vmax.bf16 %v111_v6, %v79_v7  ;;  %v81_v17 = vmax.bf16 %v49_v12, %v17_v9  ;;  %v19_v19 = vld [vmem:[%s677_s0 + $0x14] sm:$0xf]  ;;  %v50_v20 = vld [vmem:[%s678_s1 + $0x10] sm:$0xf] }
   0x6   :  { %v144_v21 = vmax.bf16 %v112_v14, %v80_v13  ;;  %v51_v22 = vld [vmem:[%s678_s1 + $0x14] sm:$0xf]  ;;  %v82_v23 = vmax.bf16 %v50_v20, %v18_v18  ;;  %v114_v24 = vld [vmem:[%s679_s2 + $0x10] sm:$0xf]  ;;  %v20_v29 = vld [vmem:[%s677_s0 + $0x18] sm:$0xf] }
   0x7   :  { %v115_v25 = vld [vmem:[%s679_s2 + $0x14] sm:$0xf]  ;;  %v290_v26 = vcombine.low %v142_v11, %v143_v16  ;;  %v145_v27 = vmax.bf16 %v113_v15, %v81_v17  ;;  %v83_v28 = vmax.bf16 %v51_v22, %v19_v19  ;;  %v21_v30 = vld [vmem:[%s677_s0 + $0x1c] sm:$0xf]  ;;  %v52_v31 = vld [vmem:[%s678_s1 + $0x18] sm:$0xf] }
   0x8   :  { %v146_v32 = vmax.bf16 %v114_v24, %v82_v23  ;;  %v53_v33 = vld [vmem:[%s678_s1 + $0x1c] sm:$0xf]  ;;  %v84_v34 = vmax.bf16 %v52_v31, %v20_v29  ;;  %v116_v35 = vld [vmem:[%s679_s2 + $0x18] sm:$0xf]  ;;  %v22_v40 = vld [vmem:[%s677_s0 + $0x20] sm:$0xf] }
   0x9   :  { %v117_v36 = vld [vmem:[%s679_s2 + $0x1c] sm:$0xf]  ;;  %214 = vst [vmem:[%s680_s3] sm:$0xff] %v290_v26   ;;  %v291_v37 = vcombine.low %v144_v21, %v145_v27  ;;  %v147_v38 = vmax.bf16 %v115_v25, %v83_v28  ;;  %v85_v39 = vmax.bf16 %v53_v33, %v21_v30  ;;  %v23_v41 = vld [vmem:[%s677_s0 + $0x24] sm:$0xf]  ;;  %v54_v42 = vld [vmem:[%s678_s1 + $0x20] sm:$0xf] }
   0xa   :  { %v148_v43 = vmax.bf16 %v116_v35, %v84_v34  ;;  %v55_v44 = vld [vmem:[%s678_s1 + $0x24] sm:$0xf]  ;;  %v86_v45 = vmax.bf16 %v54_v42, %v22_v40  ;;  %v118_v46 = vld [vmem:[%s679_s2 + $0x20] sm:$0xf]  ;;  %v24_v51 = vld [vmem:[%s677_s0 + $0x28] sm:$0xf] }
   0xb   :  { %v119_v47 = vld [vmem:[%s679_s2 + $0x24] sm:$0xf]  ;;  %292 = vst [vmem:[%s680_s3 + $0x8] sm:$0xff] %v291_v37   ;;  %v293_v48 = vcombine.low %v146_v32, %v147_v38  ;;  %v149_v49 = vmax.bf16 %v117_v36, %v85_v39  ;;  %v87_v50 = vmax.bf16 %v55_v44, %v23_v41  ;;  %v25_v52 = vld [vmem:[%s677_s0 + $0x2c] sm:$0xf] }
   0xc   :  { %v56_v53 = vld [vmem:[%s678_s1 + $0x28] sm:$0xf]  ;;  %v150_v54 = vmax.bf16 %v118_v46, %v86_v45  ;;  %v57_v55 = vld [vmem:[%s678_s1 + $0x2c] sm:$0xf]  ;;  %v26_v62 = vld [vmem:[%s677_s0 + $0x30] sm:$0xf] }
   0xd   :  { %v88_v56 = vmax.bf16 %v56_v53, %v24_v51  ;;  %v120_v57 = vld [vmem:[%s679_s2 + $0x28] sm:$0xf]  ;;  %v121_v58 = vld [vmem:[%s679_s2 + $0x2c] sm:$0xf]  ;;  %294 = vst [vmem:[%s680_s3 + $0x10] sm:$0xff] %v293_v48   ;;  %v295_v59 = vcombine.low %v148_v43, %v149_v49  ;;  %v151_v60 = vmax.bf16 %v119_v47, %v87_v50  ;;  %v89_v61 = vmax.bf16 %v57_v55, %v25_v52 }
   0xe   :  { %v27_v63 = vld [vmem:[%s677_s0 + $0x34] sm:$0xf]  ;;  %v58_v0 = vld [vmem:[%s678_s1 + $0x30] sm:$0xf]  ;;  %v28_v9 = vld [vmem:[%s677_s0 + $0x38] sm:$0xf] }
   0xf   :  { %v152_v1 = vmax.bf16 %v120_v57, %v88_v56  ;;  %v59_v2 = vld [vmem:[%s678_s1 + $0x34] sm:$0xf]  ;;  %v90_v3 = vmax.bf16 %v58_v0, %v26_v62  ;;  %v122_v4 = vld [vmem:[%s679_s2 + $0x30] sm:$0xf]  ;;  %296 = vst [vmem:[%s680_s3 + $0x18] sm:$0xff] %v295_v59   ;;  %v297_v6 = vcombine.low %v150_v54, %v151_v60  ;;  %v153_v7 = vmax.bf16 %v121_v58, %v89_v61 }
  0x10   :  { %v123_v5 = vld [vmem:[%s679_s2 + $0x34] sm:$0xf]  ;;  %v91_v8 = vmax.bf16 %v59_v2, %v27_v63  ;;  %v29_v10 = vld [vmem:[%s677_s0 + $0x3c] sm:$0xf]  ;;  %v60_v11 = vld [vmem:[%s678_s1 + $0x38] sm:$0xf] }
  0x11   :  { %v154_v12 = vmax.bf16 %v122_v4, %v90_v3  ;;  %v61_v13 = vld [vmem:[%s678_s1 + $0x3c] sm:$0xf]  ;;  %v92_v14 = vmax.bf16 %v60_v11, %v28_v9  ;;  %v124_v15 = vld [vmem:[%s679_s2 + $0x38] sm:$0xf]  ;;  %298 = vst [vmem:[%s680_s3 + $0x20] sm:$0xff] %v297_v6   ;;  %v299_v17 = vcombine.low %v152_v1, %v153_v7 }
  0x12   :  { %v125_v16 = vld [vmem:[%s679_s2 + $0x3c] sm:$0xf]  ;;  %v155_v18 = vmax.bf16 %v123_v5, %v91_v8  ;;  %v93_v19 = vmax.bf16 %v61_v13, %v29_v10  ;;  %v30_v20 = vld [vmem:[%s677_s0 + $0x40] sm:$0xf]  ;;  %v31_v21 = vld [vmem:[%s677_s0 + $0x44] sm:$0xf] }
  0x13   :  { %v62_v22 = vld [vmem:[%s678_s1 + $0x40] sm:$0xf]  ;;  %v156_v23 = vmax.bf16 %v124_v15, %v92_v14  ;;  %v63_v24 = vld [vmem:[%s678_s1 + $0x44] sm:$0xf]  ;;  %300 = vst [vmem:[%s680_s3 + $0x28] sm:$0xff] %v299_v17  }
  0x14   :  { %v94_v25 = vmax.bf16 %v62_v22, %v30_v20  ;;  %v126_v26 = vld [vmem:[%s679_s2 + $0x40] sm:$0xf]  ;;  %v127_v27 = vld [vmem:[%s679_s2 + $0x44] sm:$0xf]  ;;  %v301_v28 = vcombine.low %v154_v12, %v155_v18  ;;  %v157_v29 = vmax.bf16 %v125_v16, %v93_v19  ;;  %v95_v30 = vmax.bf16 %v63_v24, %v31_v21  ;;  %v32_v31 = vld [vmem:[%s677_s0 + $0x48] sm:$0xf] }
  0x15   :  { %v33_v32 = vld [vmem:[%s677_s0 + $0x4c] sm:$0xf]  ;;  %v64_v33 = vld [vmem:[%s678_s1 + $0x48] sm:$0xf]  ;;  %v34_v42 = vld [vmem:[%s677_s0 + $0x50] sm:$0xf] }
  0x16   :  { %v158_v34 = vmax.bf16 %v126_v26, %v94_v25  ;;  %v65_v35 = vld [vmem:[%s678_s1 + $0x4c] sm:$0xf]  ;;  %v96_v36 = vmax.bf16 %v64_v33, %v32_v31  ;;  %v128_v37 = vld [vmem:[%s679_s2 + $0x48] sm:$0xf]  ;;  %302 = vst [vmem:[%s680_s3 + $0x30] sm:$0xff] %v301_v28   ;;  %v303_v39 = vcombine.low %v156_v23, %v157_v29  ;;  %v159_v40 = vmax.bf16 %v127_v27, %v95_v30 }
  0x17   :  { %v129_v38 = vld [vmem:[%s679_s2 + $0x4c] sm:$0xf]  ;;  %v97_v41 = vmax.bf16 %v65_v35, %v33_v32  ;;  %v35_v43 = vld [vmem:[%s677_s0 + $0x54] sm:$0xf]  ;;  %v66_v44 = vld [vmem:[%s678_s1 + $0x50] sm:$0xf] }
  0x18   :  { %v160_v45 = vmax.bf16 %v128_v37, %v96_v36  ;;  %v67_v46 = vld [vmem:[%s678_s1 + $0x54] sm:$0xf]  ;;  %v98_v47 = vmax.bf16 %v66_v44, %v34_v42  ;;  %v130_v48 = vld [vmem:[%s679_s2 + $0x50] sm:$0xf]  ;;  %304 = vst [vmem:[%s680_s3 + $0x38] sm:$0xff] %v303_v39   ;;  %v305_v50 = vcombine.low %v158_v34, %v159_v40 }
  0x19   :  { %v131_v49 = vld [vmem:[%s679_s2 + $0x54] sm:$0xf]  ;;  %v161_v51 = vmax.bf16 %v129_v38, %v97_v41  ;;  %v99_v52 = vmax.bf16 %v67_v46, %v35_v43  ;;  %v36_v53 = vld [vmem:[%s677_s0 + $0x58] sm:$0xf]  ;;  %v37_v54 = vld [vmem:[%s677_s0 + $0x5c] sm:$0xf] }
  0x1a   :  { %v68_v55 = vld [vmem:[%s678_s1 + $0x58] sm:$0xf]  ;;  %v162_v56 = vmax.bf16 %v130_v48, %v98_v47  ;;  %v69_v57 = vld [vmem:[%s678_s1 + $0x5c] sm:$0xf]  ;;  %306 = vst [vmem:[%s680_s3 + $0x40] sm:$0xff] %v305_v50  }
  0x1b   :  { %v100_v58 = vmax.bf16 %v68_v55, %v36_v53  ;;  %v132_v59 = vld [vmem:[%s679_s2 + $0x58] sm:$0xf]  ;;  %v133_v60 = vld [vmem:[%s679_s2 + $0x5c] sm:$0xf]  ;;  %v307_v61 = vcombine.low %v160_v45, %v161_v51  ;;  %v163_v62 = vmax.bf16 %v131_v49, %v99_v52  ;;  %v101_v63 = vmax.bf16 %v69_v57, %v37_v54  ;;  %v38_v0 = vld [vmem:[%s677_s0 + $0x60] sm:$0xf] }
  0x1c   :  { %v39_v1 = vld [vmem:[%s677_s0 + $0x64] sm:$0xf]  ;;  %v70_v2 = vld [vmem:[%s678_s1 + $0x60] sm:$0xf]  ;;  %v40_v11 = vld [vmem:[%s677_s0 + $0x68] sm:$0xf] }
  0x1d   :  { %v164_v3 = vmax.bf16 %v132_v59, %v100_v58  ;;  %v71_v4 = vld [vmem:[%s678_s1 + $0x64] sm:$0xf]  ;;  %v102_v5 = vmax.bf16 %v70_v2, %v38_v0  ;;  %v134_v6 = vld [vmem:[%s679_s2 + $0x60] sm:$0xf]  ;;  %308 = vst [vmem:[%s680_s3 + $0x48] sm:$0xff] %v307_v61   ;;  %v309_v8 = vcombine.low %v162_v56, %v163_v62  ;;  %v165_v9 = vmax.bf16 %v133_v60, %v101_v63 }
  0x1e   :  { %v135_v7 = vld [vmem:[%s679_s2 + $0x64] sm:$0xf]  ;;  %v103_v10 = vmax.bf16 %v71_v4, %v39_v1  ;;  %v41_v12 = vld [vmem:[%s677_s0 + $0x6c] sm:$0xf]  ;;  %v72_v13 = vld [vmem:[%s678_s1 + $0x68] sm:$0xf] }
  0x1f   :  { %v166_v14 = vmax.bf16 %v134_v6, %v102_v5  ;;  %v73_v15 = vld [vmem:[%s678_s1 + $0x6c] sm:$0xf]  ;;  %v104_v16 = vmax.bf16 %v72_v13, %v40_v11  ;;  %v136_v17 = vld [vmem:[%s679_s2 + $0x68] sm:$0xf]  ;;  %310 = vst [vmem:[%s680_s3 + $0x50] sm:$0xff] %v309_v8   ;;  %v311_v19 = vcombine.low %v164_v3, %v165_v9 }
  0x20   :  { %v137_v18 = vld [vmem:[%s679_s2 + $0x6c] sm:$0xf]  ;;  %v167_v20 = vmax.bf16 %v135_v7, %v103_v10  ;;  %v105_v21 = vmax.bf16 %v73_v15, %v41_v12  ;;  %v42_v22 = vld [vmem:[%s677_s0 + $0x70] sm:$0xf]  ;;  %v43_v23 = vld [vmem:[%s677_s0 + $0x74] sm:$0xf] }
  0x21   :  { %v74_v24 = vld [vmem:[%s678_s1 + $0x70] sm:$0xf]  ;;  %v168_v25 = vmax.bf16 %v136_v17, %v104_v16  ;;  %v75_v26 = vld [vmem:[%s678_s1 + $0x74] sm:$0xf]  ;;  %312 = vst [vmem:[%s680_s3 + $0x58] sm:$0xff] %v311_v19  }
  0x22   :  { %v106_v27 = vmax.bf16 %v74_v24, %v42_v22  ;;  %v138_v28 = vld [vmem:[%s679_s2 + $0x70] sm:$0xf]  ;;  %v139_v29 = vld [vmem:[%s679_s2 + $0x74] sm:$0xf]  ;;  %v313_v30 = vcombine.low %v166_v14, %v167_v20  ;;  %v169_v31 = vmax.bf16 %v137_v18, %v105_v21  ;;  %v107_v32 = vmax.bf16 %v75_v26, %v43_v23  ;;  %v44_v33 = vld [vmem:[%s677_s0 + $0x78] sm:$0xf] }
  0x23   :  { %v45_v34 = vld [vmem:[%s677_s0 + $0x7c] sm:$0xf]  ;;  %v76_v35 = vld [vmem:[%s678_s1 + $0x78] sm:$0xf] }
  0x24   :  { %v170_v36 = vmax.bf16 %v138_v28, %v106_v27  ;;  %v77_v37 = vld [vmem:[%s678_s1 + $0x7c] sm:$0xf]  ;;  %v108_v38 = vmax.bf16 %v76_v35, %v44_v33  ;;  %v140_v39 = vld [vmem:[%s679_s2 + $0x78] sm:$0xf]  ;;  %314 = vst [vmem:[%s680_s3 + $0x60] sm:$0xff] %v313_v30   ;;  %v315_v41 = vcombine.low %v168_v25, %v169_v31  ;;  %v171_v42 = vmax.bf16 %v139_v29, %v107_v32 }
  0x25   :  { %v141_v40 = vld [vmem:[%s679_s2 + $0x7c] sm:$0xf]  ;;  %v109_v43 = vmax.bf16 %v77_v37, %v45_v34 }
  0x26   :  { %v172_v44 = vmax.bf16 %v140_v39, %v108_v38  ;;  %316 = vst [vmem:[%s680_s3 + $0x68] sm:$0xff] %v315_v41   ;;  %v317_v45 = vcombine.low %v170_v36, %v171_v42 }
  0x27   :  { %v173_v46 = vmax.bf16 %v141_v40, %v109_v43 }
  0x28   :  { %318 = vst [vmem:[%s680_s3 + $0x70] sm:$0xff] %v317_v45  }
  0x29   :  { %v319_v47 = vcombine.low %v172_v44, %v173_v46 }
  0x2b   :  { %320 = vst [vmem:[%s680_s3 + $0x78] sm:$0xff] %v319_v47  }

</bundles_post_ra>
